<compile_context>
chip_gen: v6e
topology: v6e:2x2x1
jax: 0.10.0
libtpu: 0.0.40
codegen_flags: <defaults>
</compile_context>

<pallas_src>
import functools

import jax
import jax.numpy as jnp
from jax.experimental import pallas as pl
from jax.experimental.pallas import tpu as pltpu

EPS = 1e-5  # PyTorch BatchNorm2d default


# ----------------------------------------------------------------- kernel ---

def _bottleneck_kernel(x_ref, xt_ref, xb_ref,
                       w1_ref, w2_ref, w3_ref,
                       s1_ref, b1_ref, s2_ref, b2_ref, s3_ref, b3_ref,
                       o_ref, yp_ref, *, HT, W, Cin, P, Cout, cdt):
    """Fused Bottleneck over one (batch, row-tile) block.

    x_ref : (HT, W, Cin)  f32   current row tile of the input (also residual)
    xt_ref: (1,  W, Cin)  f32   row above the tile (clamped; masked at t==0)
    xb_ref: (1,  W, Cin)  f32   row below the tile (clamped; masked at t==T-1)
    w1_ref: (Cin, P), w2_ref: (9, P, P) [k = dy*3+dx, HWIO], w3_ref: (P, Cout)
    s*/b* : folded BatchNorm scale / bias, shape (1, C), f32
    o_ref : (HT, W, Cout) f32
    yp_ref: (HT+2, W+2, P) VMEM scratch, padded conv1 output tile (cdt)
    """
    t = pl.program_id(1)
    T = pl.num_programs(1)
    f32 = jnp.float32

    w1 = w1_ref[...]
    s1 = s1_ref[...]
    b1 = b1_ref[...]

    def conv1_bn_relu(x2d_f32):
        y = jnp.dot(x2d_f32.astype(cdt), w1, preferred_element_type=f32)
        return jnp.maximum(y * s1 + b1, 0.0)

    # --- conv1 + bn1 + relu on the HT main rows (also keep f32 residual) ----
    x_main = x_ref[...].reshape(HT * W, Cin)               # f32 (residual)
    y_main = conv1_bn_relu(x_main).reshape(HT, W, P)

    # --- conv1 on halo rows; zero them at the image top/bottom boundary -----
    # (conv2 pads the *conv1 output* with zeros, so mask AFTER conv1+bn+relu)
    top_m = (t > 0).astype(f32)
    bot_m = (t < T - 1).astype(f32)
    y_top = conv1_bn_relu(xt_ref[...].reshape(W, Cin)) * top_m    # (W, P)
    y_bot = conv1_bn_relu(xb_ref[...].reshape(W, Cin)) * bot_m    # (W, P)

    # --- assemble padded conv1 tile in VMEM scratch (zero W-border columns) -
    yp_ref[...] = jnp.zeros_like(yp_ref)
    yp_ref[1:HT + 1, 1:W + 1, :] = y_main.astype(cdt)
    yp_ref[0, 1:W + 1, :] = y_top.astype(cdt)
    yp_ref[HT + 1, 1:W + 1, :] = y_bot.astype(cdt)

    # --- conv2 (3x3, stride 1) as 9 shifted row-block matmuls, f32 acc ------
    acc = jnp.zeros((HT * W, P), f32)
    for k in range(9):
        dy, dx = divmod(k, 3)
        patch = yp_ref[dy:dy + HT, dx:dx + W, :].reshape(HT * W, P)
        acc = acc + jnp.dot(patch, w2_ref[k], preferred_element_type=f32)
    y2 = jnp.maximum(acc * s2_ref[...] + b2_ref[...], 0.0)        # (HT*W, P)

    # --- conv3 + bn3 + residual add (f32) + relu ----------------------------
    z = jnp.dot(y2.astype(cdt), w3_ref[...], preferred_element_type=f32)
    z = z * s3_ref[...] + b3_ref[...] + x_main                    # f32 residual
    o_ref[...] = jnp.maximum(z, 0.0).reshape(HT, W, Cout).astype(o_ref.dtype)


# ---------------------------------------------------------------- wrapper ---

def _pick_row_tile(H, target):
    ht = min(target, H)
    while H % ht:
        ht -= 1
    return ht


def _nbytes(shape, dtype):
    n = 1
    for s in shape:
        n *= s
    return n * jnp.dtype(dtype).itemsize


def bottleneck_forward(x_nchw, p, *, use_bf16=True, row_tile=8):
    """Bottleneck forward (with_dcn=False, downsample=None, stride=dilation=1).

    x_nchw: (N, inplanes, H, W) PyTorch NCHW. Returns (N, planes*4, H, W).
    """
    N, Cin, H, W = x_nchw.shape
    planes = p["w1"].shape[1]
    Cout = p["w3"].shape[1]
    assert Cin == Cout, (
        "identity residual requires inplanes == planes * expansion "
        f"(got inplanes={Cin}, planes*4={Cout}); downsample branch not implemented")

    f32 = jnp.float32
    cdt = jnp.bfloat16 if use_bf16 else f32

    x = jnp.transpose(x_nchw, (0, 2, 3, 1)).astype(f32)   # NHWC, f32 (residual)

    HT = _pick_row_tile(H, row_tile)
    T = H // HT

    w1 = p["w1"].astype(cdt)                                # (Cin, P)
    w2 = p["w2"].reshape(9, planes, planes).astype(cdt)     # (dy*3+dx, I, O)
    w3 = p["w3"].astype(cdt)                                # (P, Cout)
    s1 = p["s1"].reshape(1, -1).astype(f32)
    b1 = p["b1"].reshape(1, -1).astype(f32)
    s2 = p["s2"].reshape(1, -1).astype(f32)
    b2 = p["b2"].reshape(1, -1).astype(f32)
    s3 = p["s3"].reshape(1, -1).astype(f32)
    b3 = p["b3"].reshape(1, -1).astype(f32)

    in_specs = [
        # main row tile of the input (also the residual)
        pl.BlockSpec((None, HT, W, Cin), lambda n, t: (n, t, 0, 0)),
        # one-row halo above / below (clamped; masked in-kernel at boundaries)
        pl.BlockSpec((None, 1, W, Cin),
                     lambda n, t: (n, jnp.maximum(t * HT - 1, 0), 0, 0)),
        pl.BlockSpec((None, 1, W, Cin),
                     lambda n, t: (n, jnp.minimum((t + 1) * HT, H - 1), 0, 0)),
        # weights / folded BN params: constant blocks (fetched once, reused)
        pl.BlockSpec((Cin, planes), lambda n, t: (0, 0)),
        pl.BlockSpec((9, planes, planes), lambda n, t: (0, 0, 0)),
        pl.BlockSpec((planes, Cout), lambda n, t: (0, 0)),
        pl.BlockSpec((1, planes), lambda n, t: (0, 0)),
        pl.BlockSpec((1, planes), lambda n, t: (0, 0)),
        pl.BlockSpec((1, planes), lambda n, t: (0, 0)),
        pl.BlockSpec((1, planes), lambda n, t: (0, 0)),
        pl.BlockSpec((1, Cout), lambda n, t: (0, 0)),
        pl.BlockSpec((1, Cout), lambda n, t: (0, 0)),
    ]
    out_specs = pl.BlockSpec((None, HT, W, Cout), lambda n, t: (n, t, 0, 0))
    scratch_shapes = [pltpu.VMEM((HT + 2, W + 2, planes), cdt)]

    # Explicit VMEM budget: double-buffered blocks + scratch, with headroom.
    block_bytes = (
        _nbytes((HT, W, Cin), f32) + 2 * _nbytes((1, W, Cin), f32)
        + _nbytes((HT, W, Cout), f32)
        + _nbytes((Cin, planes), cdt) + _nbytes((9, planes, planes), cdt)
        + _nbytes((planes, Cout), cdt)
        + 4 * _nbytes((1, planes), f32) + 2 * _nbytes((1, Cout), f32))
    scratch_bytes = _nbytes((HT + 2, W + 2, planes), cdt)
    vmem_limit = int(min(max(3 * (2 * block_bytes + scratch_bytes),
                             16 * 1024 * 1024), 100 * 1024 * 1024))

    kernel = functools.partial(_bottleneck_kernel, HT=HT, W=W, Cin=Cin,
                               P=planes, Cout=Cout, cdt=cdt)

    out = pl.pallas_call(
        kernel,
        out_shape=jax.ShapeDtypeStruct((N, H, W, Cout), f32),
        grid=(N, T),
        in_specs=in_specs,
        out_specs=out_specs,
        scratch_shapes=scratch_shapes,
        compiler_params=pltpu.CompilerParams(
            dimension_semantics=("parallel", "parallel"),
            vmem_limit_bytes=vmem_limit),
    )(x, x, x, w1, w2, w3, s1, b1, s2, b2, s3, b3)

    return jnp.transpose(out, (0, 3, 1, 2))   # back to NCHW


# -------------------------------------------------------------- reference ---

def bottleneck_ref(x_nchw, p):
    x = jnp.transpose(x_nchw, (0, 2, 3, 1)).astype(jnp.float32)
    out = jnp.einsum("nhwc,cd->nhwd", x, p["w1"]) * p["s1"] + p["b1"]
    out = jnp.maximum(out, 0.0)
    out = jax.lax.conv_general_dilated(
        out, p["w2"], (1, 1), "SAME",
        dimension_numbers=("NHWC", "HWIO", "NHWC"))
    out = jnp.maximum(out * p["s2"] + p["b2"], 0.0)
    out = jnp.einsum("nhwc,cd->nhwd", out, p["w3"]) * p["s3"] + p["b3"]
    out = jnp.maximum(out + x, 0.0)
    return jnp.transpose(out, (0, 3, 1, 2))


# ------------------------------------------------------------------ setup ---

def make_params(key, inplanes, planes):
    ks = jax.random.split(key, 16)
    exp = 4

    def bn_fold(kg, kb, km, kv, c):
        gamma = 1.0 + 0.1 * jax.random.normal(kg, (c,), jnp.float32)
        beta = 0.1 * jax.random.normal(kb, (c,), jnp.float32)
        mean = 0.1 * jax.random.normal(km, (c,), jnp.float32)
        var = jnp.abs(jax.random.normal(kv, (c,), jnp.float32)) + 0.5
        s = gamma / jnp.sqrt(var + EPS)
        b = beta - mean * s
        return s, b

    w1 = 0.1 * jax.random.normal(ks[0], (inplanes, planes), jnp.float32)
    w2 = 0.1 * jax.random.normal(ks[1], (3, 3, planes, planes), jnp.float32)
    w3 = 0.1 * jax.random.normal(ks[2], (planes, planes * exp), jnp.float32)
    s1, b1 = bn_fold(ks[3], ks[4], ks[5], ks[6], planes)
    s2, b2 = bn_fold(ks[7], ks[8], ks[9], ks[10], planes)
    s3, b3 = bn_fold(ks[11], ks[12], ks[13], ks[14], planes * exp)
    return dict(w1=w1, w2=w2, w3=w3, s1=s1, b1=b1, s2=s2, b2=b2, s3=s3, b3=b3)


if __name__ == "__main__":
    key = jax.random.PRNGKey(0)
    k_param, k_x = jax.random.split(key)

    inplanes, planes = 16, 4          # inplanes == planes * expansion (=4)
    N, H, W = 2, 16, 16               # H=16 with HT=8 -> 2 row tiles per image
    params = make_params(k_param, inplanes, planes)
    x = jax.random.normal(k_x, (N, inplanes, H, W), jnp.float32)

    ref = jax.block_until_ready(bottleneck_ref(x, params))

    # f32 path: strict check against the f32 reference.
    out_f32 = jax.block_until_ready(
        bottleneck_forward(x, params, use_bf16=False))
    assert out_f32.shape == (N, planes * 4, H, W)
    err_f32 = float(jnp.max(jnp.abs(out_f32 - ref)))
    assert err_f32 < 1e-4, f"f32 path max abs err {err_f32}"

    # bf16-operand path (f32 accumulation + f32 epilogue/residual): loose check.
    out_bf16 = jax.block_until_ready(
        bottleneck_forward(x, params, use_bf16=True))
    err_bf16 = float(jnp.max(jnp.abs(out_bf16 - ref)))
    assert err_bf16 < 8e-2, f"bf16 path max abs err {err_bf16}"

    print("KERNEL_OK")
</pallas_src>

<mosaic_0001>
module attributes {stable_mosaic.version = 11 : i64} {
  func.func @_bottleneck_kernel(%arg0: i32, %arg1: i32, %arg2: memref<1x8x16x16xf32, #tpu.memory_space<vmem>>, %arg3: memref<1x1x16x16xf32, #tpu.memory_space<vmem>>, %arg4: memref<1x1x16x16xf32, #tpu.memory_space<vmem>>, %arg5: memref<16x4xf32, #tpu.memory_space<vmem>>, %arg6: memref<9x4x4xf32, #tpu.memory_space<vmem>>, %arg7: memref<4x16xf32, #tpu.memory_space<vmem>>, %arg8: memref<1x4xf32, #tpu.memory_space<vmem>>, %arg9: memref<1x4xf32, #tpu.memory_space<vmem>>, %arg10: memref<1x4xf32, #tpu.memory_space<vmem>>, %arg11: memref<1x4xf32, #tpu.memory_space<vmem>>, %arg12: memref<1x16xf32, #tpu.memory_space<vmem>>, %arg13: memref<1x16xf32, #tpu.memory_space<vmem>>, %arg14: memref<1x8x16x16xf32, #tpu.memory_space<vmem>>, %arg15: memref<10x18x4xf32, #tpu.memory_space<vmem>>) attributes {dimension_semantics = [#tpu.dimension_semantics<parallel>, #tpu.dimension_semantics<parallel>], iteration_bounds = array<i64: 2, 2>, scalar_prefetch = 0 : i64, scratch_operands = 1 : i64, tpu.core_type = #tpu.core_type<tc>, window_params = [{transform_indices = @transform_0, window_bounds = array<i64: 1, 8, 16, 16>}, {transform_indices = @transform_1, window_bounds = array<i64: 1, 1, 16, 16>}, {transform_indices = @transform_2, window_bounds = array<i64: 1, 1, 16, 16>}, {pipeline_mode = #tpu.pipeline_mode<synchronous>, transform_indices = @transform_3, window_bounds = array<i64: 16, 4>}, {pipeline_mode = #tpu.pipeline_mode<synchronous>, transform_indices = @transform_4, window_bounds = array<i64: 9, 4, 4>}, {pipeline_mode = #tpu.pipeline_mode<synchronous>, transform_indices = @transform_5, window_bounds = array<i64: 4, 16>}, {pipeline_mode = #tpu.pipeline_mode<synchronous>, transform_indices = @transform_6, window_bounds = array<i64: 1, 4>}, {pipeline_mode = #tpu.pipeline_mode<synchronous>, transform_indices = @transform_7, window_bounds = array<i64: 1, 4>}, {pipeline_mode = #tpu.pipeline_mode<synchronous>, transform_indices = @transform_8, window_bounds = array<i64: 1, 4>}, {pipeline_mode = #tpu.pipeline_mode<synchronous>, transform_indices = @transform_9, window_bounds = array<i64: 1, 4>}, {pipeline_mode = #tpu.pipeline_mode<synchronous>, transform_indices = @transform_10, window_bounds = array<i64: 1, 16>}, {pipeline_mode = #tpu.pipeline_mode<synchronous>, transform_indices = @transform_11, window_bounds = array<i64: 1, 16>}, {transform_indices = @transform_12, window_bounds = array<i64: 1, 8, 16, 16>}]} {
    %c0 = arith.constant 0 : index
    %c0_0 = arith.constant 0 : index
    %0 = vector.load %arg5[%c0, %c0_0] : memref<16x4xf32, #tpu.memory_space<vmem>>, vector<16x4xf32>
    %c0_1 = arith.constant 0 : index
    %c0_2 = arith.constant 0 : index
    %1 = vector.load %arg8[%c0_1, %c0_2] : memref<1x4xf32, #tpu.memory_space<vmem>>, vector<1x4xf32>
    %c0_3 = arith.constant 0 : index
    %c0_4 = arith.constant 0 : index
    %2 = vector.load %arg9[%c0_3, %c0_4] : memref<1x4xf32, #tpu.memory_space<vmem>>, vector<1x4xf32>
    %c0_5 = arith.constant 0 : index
    %c0_6 = arith.constant 0 : index
    %c0_7 = arith.constant 0 : index
    %c0_8 = arith.constant 0 : index
    %3 = vector.load %arg2[%c0_5, %c0_6, %c0_7, %c0_8] : memref<1x8x16x16xf32, #tpu.memory_space<vmem>>, vector<1x8x16x16xf32>
    %4 = vector.shape_cast %3 : vector<1x8x16x16xf32> to vector<8x16x16xf32>
    %5 = vector.shape_cast %4 : vector<8x16x16xf32> to vector<128x16xf32>
    %cst = arith.constant dense<0.000000e+00> : vector<128x4xf32>
    %6 = tpu.matmul %5, %0, %cst {dimension_numbers = #tpu.dot_dimension_numbers<[1], [0], [0], [1], [0, 0, 1, 1], [], []>} : vector<128x16xf32>, vector<16x4xf32>, vector<128x4xf32> -> vector<128x4xf32>
    %7 = vector.broadcast %1 : vector<1x4xf32> to vector<128x4xf32>
    %8 = arith.mulf %6, %7 : vector<128x4xf32>
    %9 = vector.broadcast %2 : vector<1x4xf32> to vector<128x4xf32>
    %10 = arith.addf %8, %9 : vector<128x4xf32>
    %cst_9 = arith.constant 0.000000e+00 : f32
    %11 = vector.broadcast %cst_9 : f32 to vector<128x4xf32>
    %12 = arith.maximumf %10, %11 : vector<128x4xf32>
    %13 = vector.shape_cast %12 : vector<128x4xf32> to vector<8x16x4xf32>
    %c0_i32 = arith.constant 0 : i32
    %14 = arith.cmpi sgt, %arg1, %c0_i32 : i32
    %15 = arith.extui %14 : i1 to i32
    %16 = arith.sitofp %15 : i32 to f32
    %c1_i32 = arith.constant 1 : i32
    %17 = arith.cmpi slt, %arg1, %c1_i32 : i32
    %18 = arith.extui %17 : i1 to i32
    %19 = arith.sitofp %18 : i32 to f32
    %c0_10 = arith.constant 0 : index
    %c0_11 = arith.constant 0 : index
    %c0_12 = arith.constant 0 : index
    %c0_13 = arith.constant 0 : index
    %20 = vector.load %arg3[%c0_10, %c0_11, %c0_12, %c0_13] : memref<1x1x16x16xf32, #tpu.memory_space<vmem>>, vector<1x1x16x16xf32>
    %21 = vector.shape_cast %20 : vector<1x1x16x16xf32> to vector<1x16x16xf32>
    %22 = vector.shape_cast %21 : vector<1x16x16xf32> to vector<16x16xf32>
    %cst_14 = arith.constant dense<0.000000e+00> : vector<16x4xf32>
    %23 = tpu.matmul %22, %0, %cst_14 {dimension_numbers = #tpu.dot_dimension_numbers<[1], [0], [0], [1], [0, 0, 1, 1], [], []>} : vector<16x16xf32>, vector<16x4xf32>, vector<16x4xf32> -> vector<16x4xf32>
    %24 = vector.broadcast %1 : vector<1x4xf32> to vector<16x4xf32>
    %25 = arith.mulf %23, %24 : vector<16x4xf32>
    %26 = vector.broadcast %2 : vector<1x4xf32> to vector<16x4xf32>
    %27 = arith.addf %25, %26 : vector<16x4xf32>
    %cst_15 = arith.constant 0.000000e+00 : f32
    %28 = vector.broadcast %cst_15 : f32 to vector<16x4xf32>
    %29 = arith.maximumf %27, %28 : vector<16x4xf32>
    %30 = vector.broadcast %16 : f32 to vector<16x4xf32>
    %31 = arith.mulf %29, %30 : vector<16x4xf32>
    %c0_16 = arith.constant 0 : index
    %c0_17 = arith.constant 0 : index
    %c0_18 = arith.constant 0 : index
    %c0_19 = arith.constant 0 : index
    %32 = vector.load %arg4[%c0_16, %c0_17, %c0_18, %c0_19] : memref<1x1x16x16xf32, #tpu.memory_space<vmem>>, vector<1x1x16x16xf32>
    %33 = vector.shape_cast %32 : vector<1x1x16x16xf32> to vector<1x16x16xf32>
    %34 = vector.shape_cast %33 : vector<1x16x16xf32> to vector<16x16xf32>
    %cst_20 = arith.constant dense<0.000000e+00> : vector<16x4xf32>
    %35 = tpu.matmul %34, %0, %cst_20 {dimension_numbers = #tpu.dot_dimension_numbers<[1], [0], [0], [1], [0, 0, 1, 1], [], []>} : vector<16x16xf32>, vector<16x4xf32>, vector<16x4xf32> -> vector<16x4xf32>
    %36 = vector.broadcast %1 : vector<1x4xf32> to vector<16x4xf32>
    %37 = arith.mulf %35, %36 : vector<16x4xf32>
    %38 = vector.broadcast %2 : vector<1x4xf32> to vector<16x4xf32>
    %39 = arith.addf %37, %38 : vector<16x4xf32>
    %cst_21 = arith.constant 0.000000e+00 : f32
    %40 = vector.broadcast %cst_21 : f32 to vector<16x4xf32>
    %41 = arith.maximumf %39, %40 : vector<16x4xf32>
    %42 = vector.broadcast %19 : f32 to vector<16x4xf32>
    %43 = arith.mulf %41, %42 : vector<16x4xf32>
    %cst_22 = arith.constant 0.000000e+00 : f32
    %44 = vector.broadcast %cst_22 : f32 to vector<10x18x4xf32>
    %c0_23 = arith.constant 0 : index
    %c0_24 = arith.constant 0 : index
    %c0_25 = arith.constant 0 : index
    %45 = vector.load %arg15[%c0_23, %c0_24, %c0_25] : memref<10x18x4xf32, #tpu.memory_space<vmem>>, vector<10x18x4xf32>
    tpu.vector_store %arg15[%c0_23, %c0_24, %c0_25], %44 {strides = array<i32>} : memref<10x18x4xf32, #tpu.memory_space<vmem>>, vector<10x18x4xf32>,
    %c1 = arith.constant 1 : index
    %c1_26 = arith.constant 1 : index
    %c0_27 = arith.constant 0 : index
    %46 = vector.load %arg15[%c1, %c1_26, %c0_27] : memref<10x18x4xf32, #tpu.memory_space<vmem>>, vector<8x16x4xf32>
    tpu.vector_store %arg15[%c1, %c1_26, %c0_27], %13 {strides = array<i32>} : memref<10x18x4xf32, #tpu.memory_space<vmem>>, vector<8x16x4xf32>,
    %c0_28 = arith.constant 0 : index
    %c1_29 = arith.constant 1 : index
    %c0_30 = arith.constant 0 : index
    %47 = vector.load %arg15[%c0_28, %c1_29, %c0_30] : memref<10x18x4xf32, #tpu.memory_space<vmem>>, vector<1x16x4xf32>
    %48 = vector.shape_cast %47 : vector<1x16x4xf32> to vector<16x4xf32>
    %49 = vector.shape_cast %31 : vector<16x4xf32> to vector<1x16x4xf32>
    tpu.vector_store %arg15[%c0_28, %c1_29, %c0_30], %49 {strides = array<i32>} : memref<10x18x4xf32, #tpu.memory_space<vmem>>, vector<1x16x4xf32>,
    %c9 = arith.constant 9 : index
    %c1_31 = arith.constant 1 : index
    %c0_32 = arith.constant 0 : index
    %50 = vector.load %arg15[%c9, %c1_31, %c0_32] : memref<10x18x4xf32, #tpu.memory_space<vmem>>, vector<1x16x4xf32>
    %51 = vector.shape_cast %50 : vector<1x16x4xf32> to vector<16x4xf32>
    %52 = vector.shape_cast %43 : vector<16x4xf32> to vector<1x16x4xf32>
    tpu.vector_store %arg15[%c9, %c1_31, %c0_32], %52 {strides = array<i32>} : memref<10x18x4xf32, #tpu.memory_space<vmem>>, vector<1x16x4xf32>,
    %cst_33 = arith.constant 0.000000e+00 : f32
    %53 = vector.broadcast %cst_33 : f32 to vector<128x4xf32>
    %c0_34 = arith.constant 0 : index
    %c0_35 = arith.constant 0 : index
    %c0_36 = arith.constant 0 : index
    %54 = vector.load %arg15[%c0_34, %c0_35, %c0_36] : memref<10x18x4xf32, #tpu.memory_space<vmem>>, vector<8x16x4xf32>
    %55 = vector.shape_cast %54 : vector<8x16x4xf32> to vector<128x4xf32>
    %c0_37 = arith.constant 0 : index
    %c0_38 = arith.constant 0 : index
    %c0_39 = arith.constant 0 : index
    %56 = vector.load %arg6[%c0_37, %c0_38, %c0_39] : memref<9x4x4xf32, #tpu.memory_space<vmem>>, vector<1x4x4xf32>
    %57 = vector.shape_cast %56 : vector<1x4x4xf32> to vector<4x4xf32>
    %cst_40 = arith.constant dense<0.000000e+00> : vector<128x4xf32>
    %58 = tpu.matmul %55, %57, %cst_40 {dimension_numbers = #tpu.dot_dimension_numbers<[1], [0], [0], [1], [0, 0, 1, 1], [], []>} : vector<128x4xf32>, vector<4x4xf32>, vector<128x4xf32> -> vector<128x4xf32>
    %59 = arith.addf %53, %58 : vector<128x4xf32>
    %c0_41 = arith.constant 0 : index
    %c1_42 = arith.constant 1 : index
    %c0_43 = arith.constant 0 : index
    %60 = vector.load %arg15[%c0_41, %c1_42, %c0_43] : memref<10x18x4xf32, #tpu.memory_space<vmem>>, vector<8x16x4xf32>
    %61 = vector.shape_cast %60 : vector<8x16x4xf32> to vector<128x4xf32>
    %c1_44 = arith.constant 1 : index
    %c0_45 = arith.constant 0 : index
    %c0_46 = arith.constant 0 : index
    %62 = vector.load %arg6[%c1_44, %c0_45, %c0_46] : memref<9x4x4xf32, #tpu.memory_space<vmem>>, vector<1x4x4xf32>
    %63 = vector.shape_cast %62 : vector<1x4x4xf32> to vector<4x4xf32>
    %cst_47 = arith.constant dense<0.000000e+00> : vector<128x4xf32>
    %64 = tpu.matmul %61, %63, %cst_47 {dimension_numbers = #tpu.dot_dimension_numbers<[1], [0], [0], [1], [0, 0, 1, 1], [], []>} : vector<128x4xf32>, vector<4x4xf32>, vector<128x4xf32> -> vector<128x4xf32>
    %65 = arith.addf %59, %64 : vector<128x4xf32>
    %c0_48 = arith.constant 0 : index
    %c2 = arith.constant 2 : index
    %c0_49 = arith.constant 0 : index
    %66 = vector.load %arg15[%c0_48, %c2, %c0_49] : memref<10x18x4xf32, #tpu.memory_space<vmem>>, vector<8x16x4xf32>
    %67 = vector.shape_cast %66 : vector<8x16x4xf32> to vector<128x4xf32>
    %c2_50 = arith.constant 2 : index
    %c0_51 = arith.constant 0 : index
    %c0_52 = arith.constant 0 : index
    %68 = vector.load %arg6[%c2_50, %c0_51, %c0_52] : memref<9x4x4xf32, #tpu.memory_space<vmem>>, vector<1x4x4xf32>
    %69 = vector.shape_cast %68 : vector<1x4x4xf32> to vector<4x4xf32>
    %cst_53 = arith.constant dense<0.000000e+00> : vector<128x4xf32>
    %70 = tpu.matmul %67, %69, %cst_53 {dimension_numbers = #tpu.dot_dimension_numbers<[1], [0], [0], [1], [0, 0, 1, 1], [], []>} : vector<128x4xf32>, vector<4x4xf32>, vector<128x4xf32> -> vector<128x4xf32>
    %71 = arith.addf %65, %70 : vector<128x4xf32>
    %c1_54 = arith.constant 1 : index
    %c0_55 = arith.constant 0 : index
    %c0_56 = arith.constant 0 : index
    %72 = vector.load %arg15[%c1_54, %c0_55, %c0_56] : memref<10x18x4xf32, #tpu.memory_space<vmem>>, vector<8x16x4xf32>
    %73 = vector.shape_cast %72 : vector<8x16x4xf32> to vector<128x4xf32>
    %c3 = arith.constant 3 : index
    %c0_57 = arith.constant 0 : index
    %c0_58 = arith.constant 0 : index
    %74 = vector.load %arg6[%c3, %c0_57, %c0_58] : memref<9x4x4xf32, #tpu.memory_space<vmem>>, vector<1x4x4xf32>
    %75 = vector.shape_cast %74 : vector<1x4x4xf32> to vector<4x4xf32>
    %cst_59 = arith.constant dense<0.000000e+00> : vector<128x4xf32>
    %76 = tpu.matmul %73, %75, %cst_59 {dimension_numbers = #tpu.dot_dimension_numbers<[1], [0], [0], [1], [0, 0, 1, 1], [], []>} : vector<128x4xf32>, vector<4x4xf32>, vector<128x4xf32> -> vector<128x4xf32>
    %77 = arith.addf %71, %76 : vector<128x4xf32>
    %c1_60 = arith.constant 1 : index
    %c1_61 = arith.constant 1 : index
    %c0_62 = arith.constant 0 : index
    %78 = vector.load %arg15[%c1_60, %c1_61, %c0_62] : memref<10x18x4xf32, #tpu.memory_space<vmem>>, vector<8x16x4xf32>
    %79 = vector.shape_cast %78 : vector<8x16x4xf32> to vector<128x4xf32>
    %c4 = arith.constant 4 : index
    %c0_63 = arith.constant 0 : index
    %c0_64 = arith.constant 0 : index
    %80 = vector.load %arg6[%c4, %c0_63, %c0_64] : memref<9x4x4xf32, #tpu.memory_space<vmem>>, vector<1x4x4xf32>
    %81 = vector.shape_cast %80 : vector<1x4x4xf32> to vector<4x4xf32>
    %cst_65 = arith.constant dense<0.000000e+00> : vector<128x4xf32>
    %82 = tpu.matmul %79, %81, %cst_65 {dimension_numbers = #tpu.dot_dimension_numbers<[1], [0], [0], [1], [0, 0, 1, 1], [], []>} : vector<128x4xf32>, vector<4x4xf32>, vector<128x4xf32> -> vector<128x4xf32>
    %83 = arith.addf %77, %82 : vector<128x4xf32>
    %c1_66 = arith.constant 1 : index
    %c2_67 = arith.constant 2 : index
    %c0_68 = arith.constant 0 : index
    %84 = vector.load %arg15[%c1_66, %c2_67, %c0_68] : memref<10x18x4xf32, #tpu.memory_space<vmem>>, vector<8x16x4xf32>
    %85 = vector.shape_cast %84 : vector<8x16x4xf32> to vector<128x4xf32>
    %c5 = arith.constant 5 : index
    %c0_69 = arith.constant 0 : index
    %c0_70 = arith.constant 0 : index
    %86 = vector.load %arg6[%c5, %c0_69, %c0_70] : memref<9x4x4xf32, #tpu.memory_space<vmem>>, vector<1x4x4xf32>
    %87 = vector.shape_cast %86 : vector<1x4x4xf32> to vector<4x4xf32>
    %cst_71 = arith.constant dense<0.000000e+00> : vector<128x4xf32>
    %88 = tpu.matmul %85, %87, %cst_71 {dimension_numbers = #tpu.dot_dimension_numbers<[1], [0], [0], [1], [0, 0, 1, 1], [], []>} : vector<128x4xf32>, vector<4x4xf32>, vector<128x4xf32> -> vector<128x4xf32>
    %89 = arith.addf %83, %88 : vector<128x4xf32>
    %c2_72 = arith.constant 2 : index
    %c0_73 = arith.constant 0 : index
    %c0_74 = arith.constant 0 : index
    %90 = vector.load %arg15[%c2_72, %c0_73, %c0_74] : memref<10x18x4xf32, #tpu.memory_space<vmem>>, vector<8x16x4xf32>
    %91 = vector.shape_cast %90 : vector<8x16x4xf32> to vector<128x4xf32>
    %c6 = arith.constant 6 : index
    %c0_75 = arith.constant 0 : index
    %c0_76 = arith.constant 0 : index
    %92 = vector.load %arg6[%c6, %c0_75, %c0_76] : memref<9x4x4xf32, #tpu.memory_space<vmem>>, vector<1x4x4xf32>
    %93 = vector.shape_cast %92 : vector<1x4x4xf32> to vector<4x4xf32>
    %cst_77 = arith.constant dense<0.000000e+00> : vector<128x4xf32>
    %94 = tpu.matmul %91, %93, %cst_77 {dimension_numbers = #tpu.dot_dimension_numbers<[1], [0], [0], [1], [0, 0, 1, 1], [], []>} : vector<128x4xf32>, vector<4x4xf32>, vector<128x4xf32> -> vector<128x4xf32>
    %95 = arith.addf %89, %94 : vector<128x4xf32>
    %c2_78 = arith.constant 2 : index
    %c1_79 = arith.constant 1 : index
    %c0_80 = arith.constant 0 : index
    %96 = vector.load %arg15[%c2_78, %c1_79, %c0_80] : memref<10x18x4xf32, #tpu.memory_space<vmem>>, vector<8x16x4xf32>
    %97 = vector.shape_cast %96 : vector<8x16x4xf32> to vector<128x4xf32>
    %c7 = arith.constant 7 : index
    %c0_81 = arith.constant 0 : index
    %c0_82 = arith.constant 0 : index
    %98 = vector.load %arg6[%c7, %c0_81, %c0_82] : memref<9x4x4xf32, #tpu.memory_space<vmem>>, vector<1x4x4xf32>
    %99 = vector.shape_cast %98 : vector<1x4x4xf32> to vector<4x4xf32>
    %cst_83 = arith.constant dense<0.000000e+00> : vector<128x4xf32>
    %100 = tpu.matmul %97, %99, %cst_83 {dimension_numbers = #tpu.dot_dimension_numbers<[1], [0], [0], [1], [0, 0, 1, 1], [], []>} : vector<128x4xf32>, vector<4x4xf32>, vector<128x4xf32> -> vector<128x4xf32>
    %101 = arith.addf %95, %100 : vector<128x4xf32>
    %c2_84 = arith.constant 2 : index
    %c2_85 = arith.constant 2 : index
    %c0_86 = arith.constant 0 : index
    %102 = vector.load %arg15[%c2_84, %c2_85, %c0_86] : memref<10x18x4xf32, #tpu.memory_space<vmem>>, vector<8x16x4xf32>
    %103 = vector.shape_cast %102 : vector<8x16x4xf32> to vector<128x4xf32>
    %c8 = arith.constant 8 : index
    %c0_87 = arith.constant 0 : index
    %c0_88 = arith.constant 0 : index
    %104 = vector.load %arg6[%c8, %c0_87, %c0_88] : memref<9x4x4xf32, #tpu.memory_space<vmem>>, vector<1x4x4xf32>
    %105 = vector.shape_cast %104 : vector<1x4x4xf32> to vector<4x4xf32>
    %cst_89 = arith.constant dense<0.000000e+00> : vector<128x4xf32>
    %106 = tpu.matmul %103, %105, %cst_89 {dimension_numbers = #tpu.dot_dimension_numbers<[1], [0], [0], [1], [0, 0, 1, 1], [], []>} : vector<128x4xf32>, vector<4x4xf32>, vector<128x4xf32> -> vector<128x4xf32>
    %107 = arith.addf %101, %106 : vector<128x4xf32>
    %c0_90 = arith.constant 0 : index
    %c0_91 = arith.constant 0 : index
    %108 = vector.load %arg10[%c0_90, %c0_91] : memref<1x4xf32, #tpu.memory_space<vmem>>, vector<1x4xf32>
    %109 = vector.broadcast %108 : vector<1x4xf32> to vector<128x4xf32>
    %110 = arith.mulf %107, %109 : vector<128x4xf32>
    %c0_92 = arith.constant 0 : index
    %c0_93 = arith.constant 0 : index
    %111 = vector.load %arg11[%c0_92, %c0_93] : memref<1x4xf32, #tpu.memory_space<vmem>>, vector<1x4xf32>
    %112 = vector.broadcast %111 : vector<1x4xf32> to vector<128x4xf32>
    %113 = arith.addf %110, %112 : vector<128x4xf32>
    %cst_94 = arith.constant 0.000000e+00 : f32
    %114 = vector.broadcast %cst_94 : f32 to vector<128x4xf32>
    %115 = arith.maximumf %113, %114 : vector<128x4xf32>
    %c0_95 = arith.constant 0 : index
    %c0_96 = arith.constant 0 : index
    %116 = vector.load %arg7[%c0_95, %c0_96] : memref<4x16xf32, #tpu.memory_space<vmem>>, vector<4x16xf32>
    %cst_97 = arith.constant dense<0.000000e+00> : vector<128x16xf32>
    %117 = tpu.matmul %115, %116, %cst_97 {dimension_numbers = #tpu.dot_dimension_numbers<[1], [0], [0], [1], [0, 0, 1, 1], [], []>} : vector<128x4xf32>, vector<4x16xf32>, vector<128x16xf32> -> vector<128x16xf32>
    %c0_98 = arith.constant 0 : index
    %c0_99 = arith.constant 0 : index
    %118 = vector.load %arg12[%c0_98, %c0_99] : memref<1x16xf32, #tpu.memory_space<vmem>>, vector<1x16xf32>
    %119 = vector.broadcast %118 : vector<1x16xf32> to vector<128x16xf32>
    %120 = arith.mulf %117, %119 : vector<128x16xf32>
    %c0_100 = arith.constant 0 : index
    %c0_101 = arith.constant 0 : index
    %121 = vector.load %arg13[%c0_100, %c0_101] : memref<1x16xf32, #tpu.memory_space<vmem>>, vector<1x16xf32>
    %122 = vector.broadcast %121 : vector<1x16xf32> to vector<128x16xf32>
    %123 = arith.addf %120, %122 : vector<128x16xf32>
    %124 = arith.addf %123, %5 : vector<128x16xf32>
    %cst_102 = arith.constant 0.000000e+00 : f32
    %125 = vector.broadcast %cst_102 : f32 to vector<128x16xf32>
    %126 = arith.maximumf %124, %125 : vector<128x16xf32>
    %127 = vector.shape_cast %126 : vector<128x16xf32> to vector<8x16x16xf32>
    %c0_103 = arith.constant 0 : index
    %c0_104 = arith.constant 0 : index
    %c0_105 = arith.constant 0 : index
    %c0_106 = arith.constant 0 : index
    %128 = vector.load %arg14[%c0_103, %c0_104, %c0_105, %c0_106] : memref<1x8x16x16xf32, #tpu.memory_space<vmem>>, vector<1x8x16x16xf32>
    %129 = vector.shape_cast %128 : vector<1x8x16x16xf32> to vector<8x16x16xf32>
    %130 = vector.shape_cast %127 : vector<8x16x16xf32> to vector<1x8x16x16xf32>
    tpu.vector_store %arg14[%c0_103, %c0_104, %c0_105, %c0_106], %130 {strides = array<i32>} : memref<1x8x16x16xf32, #tpu.memory_space<vmem>>, vector<1x8x16x16xf32>,
    return
  }
  func.func @transform_0(%arg0: i32, %arg1: i32) -> (i32, i32, i32, i32) {
    %c0_i32 = arith.constant 0 : i32
    %c0_i32_0 = arith.constant 0 : i32
    %c0_i32_1 = arith.constant 0 : i32
    return %arg0, %arg1, %c0_i32, %c0_i32_0 : i32, i32, i32, i32
  }
  func.func @transform_1(%arg0: i32, %arg1: i32) -> (i32, i32, i32, i32) {
    %c8_i32 = arith.constant 8 : i32
    %0 = arith.muli %arg1, %c8_i32 : i32
    %c1_i32 = arith.constant 1 : i32
    %1 = arith.subi %0, %c1_i32 : i32
    %c0_i32 = arith.constant 0 : i32
    %2 = arith.maxsi %1, %c0_i32 : i32
    %c0_i32_0 = arith.constant 0 : i32
    %c0_i32_1 = arith.constant 0 : i32
    %c0_i32_2 = arith.constant 0 : i32
    return %arg0, %2, %c0_i32_0, %c0_i32_1 : i32, i32, i32, i32
  }
  func.func @transform_2(%arg0: i32, %arg1: i32) -> (i32, i32, i32, i32) {
    %c1_i32 = arith.constant 1 : i32
    %0 = arith.addi %arg1, %c1_i32 : i32
    %c8_i32 = arith.constant 8 : i32
    %1 = arith.muli %0, %c8_i32 : i32
    %c15_i32 = arith.constant 15 : i32
    %2 = arith.minsi %1, %c15_i32 : i32
    %c0_i32 = arith.constant 0 : i32
    %c0_i32_0 = arith.constant 0 : i32
    %c0_i32_1 = arith.constant 0 : i32
    return %arg0, %2, %c0_i32, %c0_i32_0 : i32, i32, i32, i32
  }
  func.func @transform_3(%arg0: i32, %arg1: i32) -> (i32, i32) {
    %c0_i32 = arith.constant 0 : i32
    %c0_i32_0 = arith.constant 0 : i32
    %c0_i32_1 = arith.constant 0 : i32
    return %c0_i32, %c0_i32_0 : i32, i32
  }
  func.func @transform_4(%arg0: i32, %arg1: i32) -> (i32, i32, i32) {
    %c0_i32 = arith.constant 0 : i32
    %c0_i32_0 = arith.constant 0 : i32
    %c0_i32_1 = arith.constant 0 : i32
    %c0_i32_2 = arith.constant 0 : i32
    return %c0_i32, %c0_i32_0, %c0_i32_1 : i32, i32, i32
  }
  func.func @transform_5(%arg0: i32, %arg1: i32) -> (i32, i32) {
    %c0_i32 = arith.constant 0 : i32
    %c0_i32_0 = arith.constant 0 : i32
    %c0_i32_1 = arith.constant 0 : i32
    return %c0_i32, %c0_i32_0 : i32, i32
  }
  func.func @transform_6(%arg0: i32, %arg1: i32) -> (i32, i32) {
    %c0_i32 = arith.constant 0 : i32
    %c0_i32_0 = arith.constant 0 : i32
    %c0_i32_1 = arith.constant 0 : i32
    return %c0_i32, %c0_i32_0 : i32, i32
  }
  func.func @transform_7(%arg0: i32, %arg1: i32) -> (i32, i32) {
    %c0_i32 = arith.constant 0 : i32
    %c0_i32_0 = arith.constant 0 : i32
    %c0_i32_1 = arith.constant 0 : i32
    return %c0_i32, %c0_i32_0 : i32, i32
  }
  func.func @transform_8(%arg0: i32, %arg1: i32) -> (i32, i32) {
    %c0_i32 = arith.constant 0 : i32
    %c0_i32_0 = arith.constant 0 : i32
    %c0_i32_1 = arith.constant 0 : i32
    return %c0_i32, %c0_i32_0 : i32, i32
  }
  func.func @transform_9(%arg0: i32, %arg1: i32) -> (i32, i32) {
    %c0_i32 = arith.constant 0 : i32
    %c0_i32_0 = arith.constant 0 : i32
    %c0_i32_1 = arith.constant 0 : i32
    return %c0_i32, %c0_i32_0 : i32, i32
  }
  func.func @transform_10(%arg0: i32, %arg1: i32) -> (i32, i32) {
    %c0_i32 = arith.constant 0 : i32
    %c0_i32_0 = arith.constant 0 : i32
    %c0_i32_1 = arith.constant 0 : i32
    return %c0_i32, %c0_i32_0 : i32, i32
  }
  func.func @transform_11(%arg0: i32, %arg1: i32) -> (i32, i32) {
    %c0_i32 = arith.constant 0 : i32
    %c0_i32_0 = arith.constant 0 : i32
    %c0_i32_1 = arith.constant 0 : i32
    return %c0_i32, %c0_i32_0 : i32, i32
  }
  func.func @transform_12(%arg0: i32, %arg1: i32) -> (i32, i32, i32, i32) {
    %c0_i32 = arith.constant 0 : i32
    %c0_i32_0 = arith.constant 0 : i32
    %c0_i32_1 = arith.constant 0 : i32
    return %arg0, %arg1, %c0_i32, %c0_i32_0 : i32, i32, i32, i32
  }
}

</mosaic_0001>

<bundles_post_ra>
// kernel: tpu_custom_call.1
= control target key start
LH: loop header
LB: loop body
LE: loop exit
PB: predicated region body
PF: predicated region fallthrough
CT: control target
= control target key end

     0   :  { %s6178_s0 = inlined_call_operand.hbm [shape: f32[2,16,16,16], index: 0, kind: input, shape index: {}]   ;;  %s6179_s1 = inlined_call_operand.hbm [shape: f32[2,16,16,16], index: 1, kind: input, shape index: {}]   ;;  %s6180_s2 = inlined_call_operand.hbm [shape: f32[2,16,16,16], index: 2, kind: input, shape index: {}]   ;;  %s6181_s3 = inlined_call_operand.vmem [shape: f32[16,4], index: 3, kind: input, shape index: {}]   ;;  %s6182_s4 = inlined_call_operand.vmem [shape: f32[9,4,4], index: 4, kind: input, shape index: {}]   ;;  %s6183_s5 = inlined_call_operand.vmem [shape: f32[4,16], index: 5, kind: input, shape index: {}]   ;;  %s6184_s6 = inlined_call_operand.vmem [shape: f32[1,4], index: 6, kind: input, shape index: {}]   ;;  %s6185_s7 = inlined_call_operand.vmem [shape: f32[1,4], index: 7, kind: input, shape index: {}]   ;;  %s6186_s8 = inlined_call_operand.vmem [shape: f32[1,4], index: 8, kind: input, shape index: {}]   ;;  %s6187_s9 = inlined_call_operand.vmem [shape: f32[1,4], index: 9, kind: input, shape index: {}]   ;;  %s6188_s10 = inlined_call_operand.vmem [shape: f32[1,16], index: 10, kind: input, shape index: {}]   ;;  %s6189_s11 = inlined_call_operand.vmem [shape: f32[1,16], index: 11, kind: input, shape index: {}]   ;;  %s6190_s12 = inlined_call_operand.hbm [shape: f32[2,16,16,16], index: 12, kind: output, shape index: {}]  }
   0x1   :  { %6214 = sst [smem:[#allocation54_spill]] %s6178_s0 }
   0x2   :  { %6215 = sst [smem:[#allocation55_spill]] %s6179_s1 }
   0x3   :  { %6216 = sst [smem:[#allocation56_spill]] %s6180_s2 }
   0x4   :  { %6217 = sst [smem:[#allocation57_spill]] %s6181_s3 }
   0x5   :  { %6218 = sst [smem:[#allocation58_spill]] %s6182_s4 }
   0x6   :  { %6219 = sst [smem:[#allocation59_spill]] %s6183_s5 }
   0x7   :  { %6220 = sst [smem:[#allocation60_spill]] %s6184_s6 }
   0x8   :  { %6221 = sst [smem:[#allocation61_spill]] %s6185_s7 }
   0x9   :  { %6222 = sst [smem:[#allocation62_spill]] %s6186_s8 }
   0xa   :  { %6223 = sst [smem:[#allocation63_spill]] %s6187_s9 }
   0xb   :  { %6224 = sst [smem:[#allocation64_spill]] %s6188_s10 }
   0xc   :  { %6225 = sst [smem:[#allocation65_spill]] %s6189_s11 }
   0xd   :  { %6226 = sst [smem:[#allocation66_spill]] %s6190_s12 }
   0xe   :  { %17 = vsyncpa [#allocation4], 0 }
   0xf   :  { %19 = vsyncpa [#allocation4 + $0x1], 0 }
  0x10   :  { %20 = vsyncpa [#allocation7], 0 }
  0x11   :  { %22 = vsyncpa [#allocation7 + $0x1], 0 }
  0x12   :  { %23 = vsyncpa [#allocation5], 0 }
  0x13   :  { %25 = vsyncpa [#allocation5 + $0x1], 0  ;;  %s4857_s21 = smov 0   ;;  %s4859_s22 = smov 0  }
  0x14   :  { %s4861_s23 = smov 0   ;;  %s4863_s24 = smov 0  }
  0x15   :  { %s4865_s25 = smov 0   ;;  %s4867_s26 = smov 0  }
  0x16   :  { %s4869_s27 = smov 0   ;;  %s4871_s28 = smov 0  }
  0x17   :  { %s4873_s29 = smov 0   ;;  %s4875_s30 = smov 0  }
  0x18   :  { %s4877_s13 = smov 0   ;;  %s4879_s14 = smov 0  }
  0x19   :  { %s4881_s15 = smov 0   ;;  %s4883_s16 = smov 0  }
  0x1a LB: > { %6227 = sst [smem:[#allocation14_spill]] %s4745_s25  ;;  %s4928_s17 = sadd.s32 4294967295, %s4781_s16   ;;  %s4781_s16 = sphi %s4883_s16, %s31_s16   ;;  %s4777_s15 = sphi %s4881_s15, %s6347_s15   ;;  %s4773_s14 = sphi %s4879_s14, %s6346_s14   ;;  %s4769_s13 = sphi %s4877_s13, %s6345_s13   ;;  %s4765_s30 = sphi %s4875_s30, %s6344_s30   ;;  %s4761_s29 = sphi %s4873_s29, %s6343_s29   ;;  %s4757_s28 = sphi %s4871_s28, %s6352_s28   ;;  %s4753_s27 = sphi %s4869_s27, %s6351_s27   ;;  %s4749_s26 = sphi %s4867_s26, %s6341_s26   ;;  %s4745_s25 = sphi %s4865_s25, %s6340_s25   ;;  %s4741_s24 = sphi %s4863_s24, %s6339_s24   ;;  %s4737_s23 = sphi %s4861_s23, %s6350_s23   ;;  %s4733_s22 = sphi %s4859_s22, %s6349_s22   ;;  %s4729_s21 = sphi %s4857_s21, %s6348_s21  }
  0x1b   : > { %6228 = sst [smem:[#allocation15_spill]] %s4749_s26  ;;  %s40_s18 = sadd.s32 1, %s4773_s14 }
  0x1c   : > { %6229 = sst [smem:[#allocation16_spill]] %s4761_s29  ;;  %p41_p0 = scmp.ge.s32.totalorder %s40_s18, 2 }
  0x1d   : > { %6230 = sst [smem:[#allocation17_spill]] %s4765_s30  ;;  %s43_s19 = sadd.s32 1, %s4777_s15 }
  0x1e   : > { %6231 = sst [smem:[#allocation18_spill]] %s4769_s13  ;;  %p6210_p1 = scmp.eq.s32.totalorder %s4781_s16, 0 }
  0x1f   : > { %6232 = sst [smem:[#allocation19_spill]] %s4773_s14  ;;  %p6202_p2 = scmp.eq.s32.totalorder %s4928_s17, 0 }
  0x20   : > { %6233 = sst [smem:[#allocation20_spill]] %s4777_s15  ;;  %s6354_s18 = smov (%p41_p0, %s40_s18), 0 }
  0x21   : > { %6234 = sst [smem:[#allocation21_spill]] %s6354_s18  ;;  %s6356_s19 = smov (!%p41_p0, %s43_s19), %s4777_s15 }
  0x22   : > { %s48_s20 = ssub.s32 %s4773_s14, %s6354_s18  ;;  %s3638_s12 = sshll.u32 %s4773_s14, 3 }
  0x23   : > { %p45_p3 = scmp.ge.s32.totalorder %s6356_s19, 2  ;;  %s3639_s13 = sadd.s32 4294967295, %s3638_s12 }
  0x24   : > { %p77_p4 = scmp.gt.s32.totalorder %s3639_s13, 0  ;;  %s3640_s11 = sshll.u32 %s6354_s18, 3 }
  0x25   : > { %s6358_s19 = smov (%p45_p3, %s6356_s19), 0  ;;  %s3641_s9 = sadd.s32 4294967295, %s3640_s11 }
  0x26   : > { %6235 = sst [smem:[#allocation22_spill]] %s6358_s19  ;;  %s6360_s13 = smov (!%p77_p4, %s3639_s13), 0 }
  0x27   : > { %s4945_s10 = ssub.s32 %s4777_s15, %s6358_s19  ;;  %p81_p5 = scmp.gt.s32.totalorder %s3641_s9, 0 }
  0x28   : > { %6236 = sst [smem:[#allocation23_spill]] %s4945_s10  ;;  %s4948_s8 = sor.u32 %s48_s20, %s4945_s10 }
  0x29   : > { %p50_p6 = scmp.eq.s32.totalorder %s4948_s8, 0  ;;  %s88_s5 = sadd.s32 1, %s4749_s26 }
  0x2a   : > { %s6362_s9 = smov (!%p81_p5, %s3641_s9), 0  ;;  %p95_p7 = scmp.ne.s32.totalorder %s4749_s26, %s4745_s25 }
  0x2b   : > { %p101_p8 = scmp.ne.s32.totalorder %s4745_s25, %s4741_s24  ;;  %s84_s18 = ssub.s32 %s6360_s13, %s6362_s9 }
  0x2c   : > { %s4956_s19 = sadd.s32 8, %s3638_s12  ;;  %s85_s7 = sor.u32 %s84_s18, %s4945_s10 }
  0x2d   : > { %p4961_p9 = por %p95_p7, %p6210_p1  ;;  %p86_p10 = scmp.eq.s32.totalorder %s85_s7, 0 }
  0x2e   : > { %p4967_p11 = por %p101_p8, %p6202_p2  ;;  %s4972_s24 = sadd.s32 8, %s3640_s11 }
  0x2f   : > { %s4975_s9 = scalar_select %p86_p10, %s4749_s26, %s88_s5  }
  0x30   : > { %s6238_s6 = scalar_select %p4967_p11, 1, 0 }
  0x31   : > { %6240 = sst [smem:[#allocation25_spill]] %s4975_s9  ;;  %p6201_p0 = scmp.lt.s32.totalorder %s4781_s16, 4 }
  0x32   : > { %6239 = sst [smem:[#allocation24_spill]] %s6238_s6  ;;  %s4980_s12 = sshll.u32 %s4777_s15, 5 }
  0x33   : > { %s429_s7 = sand.u32 1, %s4781_s16   ;;  %s431_s18 = sand.u32 1, %s4749_s26  }
  0x34   : > { %s3651_s30 = sshll.u32 %s431_s18, 4  ;;  %s3654_s4 = sshll.u32 %s6360_s13, 1 }
  0x35   : > { %s443_s3 = sadd.s32 %s3654_s4, %s4980_s12  ;;  %s433_s6 = scalar_lea.vmem [#allocation6], %s3651_s30 }
  0x36   : > { %s446_s25 = sshll.u32 %s433_s6, 4  ;;  %s3656_s2 = sshll.u32 %s443_s3, 7  ;;  %s447_s25 = int_to_ptr.vmem [resolvable:$true] %s446_s25 }
  0x37   : > { %s6241_s1 = sld [smem:[#allocation55_spill]]  ;;  %p4992_p3 = pnand %p6201_p0, %p4961_p9 }
  0x38   : > { %p3662_p4 = scmp.ge.s32.totalorder %s4781_s16, 1  ;;  %p481_p5 = scmp.lt.s32.totalorder %s4781_s16, 5 }
  0x39   : > { %s4998_s18 = scalar_lea.sflag [#allocation7], %s429_s7  ;;  %p4547_p7 = pneg %p4992_p3 }
  0x3a   : > { %s4558_s4 = scalar_lea.vmem %s447_s25, 256  ;;  %s4783_s3 = smov [#allocation6]  }
  0x3b   : > { %p4559_p8 = scmp.ne.s32.totalorder %s447_s25, %s4558_s4  ;;  %s4563_s6 = sshll.u32 %s4783_s3, 4  ;;  %s4564_s6 = int_to_ptr.vmem [resolvable:$false] %s4563_s6 }
  0x3c   : > { %p4566_p12 = scmp.lt.s32.totalorder %s447_s25, %s4564_s6 }
  0x3d   : > { %s445_s5 = scalar_lea.hbm %s6241_s1, %s3656_s2  ;;  %p4561_p10 = pnand %p4559_p8, %p4547_p7 }
  0x3e   : > { %s4565_s2 = scalar_lea.vmem %s4564_s6, 512 }
  0x3f   : > { %p4562_p13 = pneg %p4561_p10  ;;  %p4567_p9 = scmp.lt.s32.totalorder %s4565_s2, %s4558_s4 }
  0x41   : > { %p4568_p0 = por %p4567_p9, %p4566_p12 }
  0x43   : > { %p4569_p2 = pnand %p4568_p0, %p4562_p13 }
  0x45   : > { %4572 = shalt.err (!%p4569_p2)
}
  0x46   : > { %s6203_s10 = smov 128   ;;  %s6205_s30 = smov 8  }
  0x47   : > { %4402 = dma.hbm_to_vmem [thread:$0]  (!%p4992_p3), %s445_s5, 256, %s447_s25, %s4998_s18, %s6203_s10, %s6203_s10, %s6205_s30  }
  0x48   : > { %p5012_p2 = pnand %p3662_p4, %p481_p5  ;;  %s3637_s20 = sadd.s32 4294967294, %s4781_s16  }
  0x49   : > { %s52_s7 = sadd.s32 1, %s4761_s29  ;;  %p59_p12 = scmp.ne.s32.totalorder %s4761_s29, %s4757_s28 }
  0x4a   : > { %s5021_s11 = scalar_select %p50_p6, %s4761_s29, %s52_s7  }
  0x4b   : > { %p65_p13 = scmp.ne.s32.totalorder %s4757_s28, %s4753_s27  ;;  %p352_p0 = scmp.eq.s32.totalorder %s4928_s17, 3 }
  0x4c   : > { %6244 = sst [smem:[#allocation26_spill]] %s5021_s11  ;;  %p358_p7 = scmp.eq.s32.totalorder %s3637_s20, 3 }
  0x4d   : > { %p5030_p8 = por %p6210_p1, %p59_p12  ;;  %p6246_p3 = scmp.eq.s32.totalorder %s4928_s17, 0 }
  0x4e   : > { %p5040_p5 = por %p352_p0, %p59_p12  ;;  %p5044_p6 = por %p358_p7, %p65_p13 }
  0x4f   : > { %p5036_p4 = por %p6246_p3, %p65_p13  ;;  %s405_s4 = sand.u32 1, %s4761_s29  }
  0x50   : > { %s6248_s8 = scalar_select %p5040_p5, 1, 0 }
  0x51   : > { %s6249_s5 = scalar_select %p5044_p6, 1, 0 }
  0x52   : > { %s3882_s3 = sshll.u32 %s4773_s14, 4  ;;  %s3646_s6 = sshll.u32 %s405_s4, 7 }
  0x53   : > { %s416_s2 = sadd.s32 %s3882_s3, %s4980_s12  ;;  %s409_s7 = scalar_lea.vmem [#allocation3], %s3646_s6 }
  0x54   : > { %s3650_s20 = sshll.u32 %s416_s2, 7  ;;  %s419_s10 = sshll.u32 %s409_s7, 4  ;;  %s420_s10 = int_to_ptr.vmem [resolvable:$true] %s419_s10 }
  0x55   : > { %s6250_s0 = sld [smem:[#allocation54_spill]]  ;;  %p6251_p10 = scmp.lt.s32.totalorder %s4781_s16, 4 }
  0x56   : > { %s406_s26 = scalar_lea.sflag [#allocation4], %s405_s4  ;;  %s4586_s14 = scalar_lea.vmem %s420_s10, 2048 }
  0x57   : > { %p5058_p9 = pnand %p6251_p10, %p5030_p8  ;;  %p4587_p13 = scmp.ne.s32.totalorder %s420_s10, %s4586_s14 }
  0x58   : > { %s4786_s3 = smov [#allocation3]  }
  0x59   : > { %p4575_p12 = pneg %p5058_p9  ;;  %s4591_s6 = sshll.u32 %s4786_s3, 4  ;;  %s4592_s6 = int_to_ptr.vmem [resolvable:$false] %s4591_s6 }
  0x5a   : > { %s4593_s1 = scalar_lea.vmem %s4592_s6, 4096  ;;  %p4594_p3 = scmp.lt.s32.totalorder %s420_s10, %s4592_s6 }
  0x5b   : > { %s418_s15 = scalar_lea.hbm %s6250_s0, %s3650_s20  ;;  %p4589_p0 = pnand %p4587_p13, %p4575_p12 }
  0x5c   : > { %p4595_p1 = scmp.lt.s32.totalorder %s4593_s1, %s4586_s14 }
  0x5d   : > { %p4590_p7 = pneg %p4589_p0 }
  0x5e   : > { %p4596_p6 = por %p4595_p1, %p4594_p3 }
  0x60   : > { %p4597_p5 = pnand %p4596_p6, %p4590_p7 }
  0x62   : > { %4600 = shalt.err (!%p4597_p5)
}
  0x63   : > { %s6253_s30 = smov 8   ;;  %s6254_s25 = smov 128  }
  0x64   : > { %s6255_s4 = sld [smem:[#allocation23_spill]]  ;;  %p6256_p1 = scmp.lt.s32.totalorder %s4956_s19, 15 }
  0x65   : > { %4399 = dma.hbm_to_vmem [thread:$0]  (!%p5058_p9), %s418_s15, 2048, %s420_s10, %s406_s26, %s6254_s25, %s6254_s25, %s6253_s30  }
  0x66   : > { %s6364_s19 = smov (!%p6256_p1, %s4956_s19), 15  ;;  %p6257_p8 = scmp.lt.s32.totalorder %s4972_s24, 15 }
  0x67   : > { %s124_s14 = sadd.s32 1, %s4737_s23  ;;  %p131_p5 = scmp.ne.s32.totalorder %s4737_s23, %s4733_s22 }
  0x68   : > { %s6366_s24 = smov (!%p6257_p8, %s4972_s24), 15  ;;  %p137_p6 = scmp.ne.s32.totalorder %s4733_s22, %s4729_s21 }
  0x69   : > { %s120_s11 = ssub.s32 %s6364_s19, %s6366_s24  ;;  %p6258_p10 = scmp.eq.s32.totalorder %s4781_s16, 0 }
  0x6a   : > { %s121_s2 = sor.u32 %s120_s11, %s6255_s4  ;;  %p6260_p0 = scmp.eq.s32.totalorder %s4928_s17, 0 }
  0x6b   : > { %p5083_p12 = por %p131_p5, %p6258_p10  ;;  %p122_p13 = scmp.eq.s32.totalorder %s121_s2, 0 }
  0x6c   : > { %p5089_p7 = por %p137_p6, %p6260_p0  ;;  %s458_s15 = sand.u32 1, %s4737_s23  }
  0x6d   : > { %s3659_s10 = sshll.u32 %s6364_s19, 1  ;;  %s3657_s24 = sshll.u32 %s458_s15, 4 }
  0x6e   : > { %s6261_s26 = scalar_select %p5089_p7, 1, 0 }
  0x6f   : > { %s5095_s7 = scalar_select %p122_p13, %s4737_s23, %s124_s14  }
  0x70   : > { %s470_s3 = sadd.s32 %s3659_s10, %s4980_s12  ;;  %s6262_s4 = sld [smem:[#allocation56_spill]] }
  0x71   : > { %s3661_s21 = sshll.u32 %s470_s3, 7  ;;  %s460_s0 = scalar_lea.vmem [#allocation8], %s3657_s24 }
  0x72   : > { %s473_s29 = sshll.u32 %s460_s0, 4  ;;  %p6263_p9 = scmp.lt.s32.totalorder %s4781_s16, 4  ;;  %s474_s29 = int_to_ptr.vmem [resolvable:$true] %s473_s29 }
  0x73   : > { %s4614_s19 = scalar_lea.vmem %s474_s29, 256  ;;  %s4787_s12 = smov [#allocation8]  }
  0x74   : > { %p5105_p3 = pnand %p6263_p9, %p5083_p12  ;;  %p4615_p8 = scmp.ne.s32.totalorder %s474_s29, %s4614_s19 }
  0x75   : > { %s4619_s14 = sshll.u32 %s4787_s12, 4  ;;  %s4620_s14 = int_to_ptr.vmem [resolvable:$false] %s4619_s14 }
  0x76   : > { %s472_s11 = scalar_lea.hbm %s6262_s4, %s3661_s21  ;;  %p4603_p1 = pneg %p5105_p3 }
  0x77   : > { %s4621_s15 = scalar_lea.vmem %s4620_s14, 512  ;;  %p4622_p10 = scmp.lt.s32.totalorder %s474_s29, %s4620_s14 }
  0x78   : > { %p4617_p5 = pnand %p4615_p8, %p4603_p1  ;;  %p4623_p13 = scmp.lt.s32.totalorder %s4621_s15, %s4614_s19 }
  0x7a   : > { %p4618_p6 = pneg %p4617_p5  ;;  %p4624_p0 = por %p4623_p13, %p4622_p10 }
  0x7c   : > { %p4625_p7 = pnand %p4624_p0, %p4618_p6 }
  0x7e   : > { %4628 = shalt.err (!%p4625_p7)
}
  0x7f   : > { %4405 = dma.hbm_to_vmem [thread:$0]  (!%p5105_p3), %s472_s11, 256, %s474_s29, %s4998_s18, %s6254_s25, %s6254_s25, %s6253_s30  }
  0x80   : > { %485 = sbr.rel (%p5012_p2) target bundleno = 963 (0x3c3), region = 68 }
  0x85   : > { %s5120_s0 = sand.u32 1, %s4757_s28  }
  0x86   : > { %s3663_s20 = sshll.u32 %s5120_s0, 7  ;;  %s488_s10 = scalar_lea.sflag [#allocation4], %s5120_s0 }
  0x87   : > { %s5126_s24 = scalar_lea.vmem [#allocation3], %s3663_s20 }
  0x88   : > { %4712 = dma.done.wait (%p5036_p4), %s488_s10, 2048  }
  0x89   : > { %4714 = vsyncadd (%p5036_p4), %s488_s10, 4294965248  ;;  %s6265_s29 = sld [smem:[#allocation14_spill]]  ;;  %s496_s13 = sand.u32 1, %s4928_s17  }
  0x8a   : > { %s497_s3 = scalar_lea.sflag [#allocation7], %s496_s13 }
  0x8f   : > { %s498_s30 = sand.u32 1, %s6265_s29  }
  0x90   : > { %s5134_s25 = sshll.u32 %s498_s30, 4 }
  0x91   : > { %s500_s21 = scalar_lea.vmem [#allocation6], %s5134_s25 }
  0x92   : > { %4716 = dma.done.wait (%p4967_p11), %s497_s3, 256  }
  0x93   : > { %4718 = vsyncadd (%p4967_p11), %s497_s3, 4294967040  ;;  %s507_s6 = sand.u32 1, %s4733_s22   ;;  %p6267_p2 = scmp.ne.s32.totalorder %s6261_s26, 0 }
  0x94   : > { %s5142_s9 = sshll.u32 %s507_s6, 4 }
  0x95   : > { %s509_s1 = scalar_lea.vmem [#allocation8], %s5142_s9 }
  0x96   : > { %4720 = dma.done.wait (%p6267_p2), %s497_s3, 256  }
  0x97   : > { %4722 = vsyncadd (%p6267_p2), %s497_s3, 4294967040  ;;  %vm590_vm0 = vcmask 130048   ;;  %s6268_s11 = sld [smem:[#allocation57_spill]]  ;;  %v584_v2 = vld [vmem:[%s5126_s24 + $0x50] sm:$0xff]  ;;  %v585_v3 = vld [vmem:[%s5126_s24 + $0x58] sm:$0xff]  ;;  %vm1034_vm1 = vcmask 31744  }
  0x98   : > { %4101 = vmatprep.mubr.msk.f32.mxu1 %vm590_vm0, %v584_v2  ;;  %v586_v4 = vld [vmem:[%s5126_s24 + $0x60] sm:$0xff]  ;;  %v587_v6 = vld [vmem:[%s5126_s24 + $0x68] sm:$0xff]  ;;  %v588_v8 = vld [vmem:[%s5126_s24 + $0x70] sm:$0xff]  ;;  %vm1037_vm2 = vcmask 25600   ;;  %v4788_v22 = vmov 0.0   ;;  %s6269_s14 = sld [smem:[#allocation58_spill]] }
  0x99   : > { %v574_v5 = vld [vmem:[%s5126_s24] sm:$0xff]  ;;  %v575_v7 = vld [vmem:[%s5126_s24 + $0x8] sm:$0xff]  ;;  %v576_v9 = vld [vmem:[%s5126_s24 + $0x10] sm:$0xff]  ;;  %1055 = vst.msk [vmem:[#allocation2 + $0x98] sm:$0xff] %vm1034_vm1, %v4788_v22  ;;  %vm1171_vm3 = vcmask 1043456   ;;  %s6271_s18 = sld [smem:[#allocation17_spill]] }
  0x9a   : > { %4086 = vmatprep.mubr.msk.f32.mxu0 %vm590_vm0, %v574_v5  ;;  %v589_v10 = vld [vmem:[%s5126_s24 + $0x78] sm:$0xff]  ;;  %v850_v12 = vld [vmem:[%s500_s21] sm:$0xff]  ;;  %v579_v15 = vld [vmem:[%s5126_s24 + $0x28] sm:$0xff]  ;;  %1056 = vst.msk [vmem:[#allocation2 + $0xa0] sm:$0x3] %vm1037_vm2, %v4788_v22  ;;  %s6272_s9 = sld [smem:[#allocation60_spill]] }
  0x9b   : > { %v577_v11 = vld [vmem:[%s5126_s24 + $0x18] sm:$0xff]  ;;  %v578_v13 = vld [vmem:[%s5126_s24 + $0x20] sm:$0xff]  ;;  %v580_v16 = vld [vmem:[%s5126_s24 + $0x30] sm:$0xff]  ;;  %1035 = vst.msk [vmem:[#allocation2] sm:$0xff] %vm1034_vm1, %v4788_v22  ;;  %s6273_s4 = sld [smem:[#allocation61_spill]]  ;;  %s6020_s6 = scalar_lea.vmem [#allocation9], %s3663_s20 }
  0x9c   : > { %v851_v14 = vld [vmem:[%s500_s21 + $0x8] sm:$0xff]  ;;  %v942_v17 = vld [vmem:[%s509_s1] sm:$0xff]  ;;  %1036 = vst.msk [vmem:[#allocation2 + $0x8] sm:$0xff] %vm1034_vm1, %v4788_v22  ;;  %1039 = vst.msk [vmem:[#allocation2 + $0x18] sm:$0xff] %vm1034_vm1, %v4788_v22  ;;  %s6303_s15 = sld [smem:[#allocation63_spill]]  ;;  %p6336_p7 = scmp.ne.s32.totalorder %s6248_s8, 0 }
  0x9d   : > { %v571_v0 = vld [vmem:[%s6268_s11 + $0x8] sm:$0xff]  ;;  %v570_v1 = vld [vmem:[%s6268_s11] sm:$0xff]  ;;  %v582_v20 = vld [vmem:[%s5126_s24 + $0x40] sm:$0xff]  ;;  %1038 = vst.msk [vmem:[#allocation2 + $0x10] sm:$0x3] %vm1037_vm2, %v4788_v22  ;;  %s6331_s30 = sld [smem:[#allocation64_spill]] }
  0x9e   : > { %4384 = vmatprep.subr.mxu1 %v571_v0  ;;  %4082 = vmatprep.subr.mxu0 %v571_v0  ;;  %v581_v18 = vld [vmem:[%s5126_s24 + $0x38] sm:$0xff]  ;;  %v583_v21 = vld [vmem:[%s5126_s24 + $0x48] sm:$0xff]  ;;  %1040 = vst.msk [vmem:[#allocation2 + $0x20] sm:$0xff] %vm1034_vm1, %v4788_v22  ;;  %1042 = vst.msk [vmem:[#allocation2 + $0x30] sm:$0xff] %vm1034_vm1, %v4788_v22  ;;  %s6270_s10 = smov %s6269_s14  ;;  %s6332_s21 = sld [smem:[#allocation65_spill]] }
  0x9f   : > { %4386 = vmatpush3.msra.mxu1 %v571_v0  ;;  %4083 = vmatpush3.msra.mxu0 %v571_v0  ;;  %v943_v19 = vld [vmem:[%s509_s1 + $0x8] sm:$0xff]  ;;  %1041 = vst.msk [vmem:[#allocation2 + $0x28] sm:$0x3] %vm1037_vm2, %v4788_v22  ;;  %1044 = vst.msk [vmem:[#allocation2 + $0x40] sm:$0x3] %vm1037_vm2, %v4788_v22  ;;  %p844_p11 = scmp.gt.s32.totalorder %s6271_s18, 0 }
  0xa0   : > { %4385 = vmatprep.subr.mxu1 %v570_v1  ;;  %4084 = vmatprep.subr.mxu0 %v570_v1  ;;  %1043 = vst.msk [vmem:[#allocation2 + $0x38] sm:$0xff] %vm1034_vm1, %v4788_v22  ;;  %1045 = vst.msk [vmem:[#allocation2 + $0x48] sm:$0xff] %vm1034_vm1, %v4788_v22  ;;  %v3689_v23 = vld [vmem:[%s6269_s14 + $0x4] sm:$0xf]  ;;  %v1104_v24 = vld [vmem:[%s6270_s10] sm:$0xf] }
  0xa1   : > { %4387 = vmatpush3.msra.mxu1 %v570_v1  ;;  %4085 = vmatpush3.msra.mxu0 %v570_v1  ;;  %1046 = vst.msk [vmem:[#allocation2 + $0x50] sm:$0xff] %vm1034_vm1, %v4788_v22  ;;  %1048 = vst.msk [vmem:[#allocation2 + $0x60] sm:$0xff] %vm1034_vm1, %v4788_v22  ;;  %v5242_v25 = vld [vmem:[%s6270_s10 + $0x8] sm:$0xf]  ;;  %v5249_v26 = vld [vmem:[%s6270_s10 + $0xc] sm:$0xf] }
  0xa2   : > { %4102 = vmatmul.mubr.msk.f32.vlgmr.msra.gmra.mxu1 %vm590_vm0, %v585_v3  ;;  %4110 = vmatprep.subr.mxu1 %v571_v0  ;;  %1047 = vst.msk [vmem:[#allocation2 + $0x58] sm:$0x3] %vm1037_vm2, %v4788_v22  ;;  %1050 = vst.msk [vmem:[#allocation2 + $0x70] sm:$0x3] %vm1037_vm2, %v4788_v22  ;;  %v5256_v27 = vld [vmem:[%s6272_s9] ss:$0 sm:$0xff] }
  0xa3   : > { %4111 = vmatpush3.msra.mxu1 %v571_v0  ;;  %4104 = vmatprep.mubr.msk.f32.mxu1 %vm590_vm0, %v586_v4  ;;  %1049 = vst.msk [vmem:[#allocation2 + $0x68] sm:$0xff] %vm1034_vm1, %v4788_v22  ;;  %1051 = vst.msk [vmem:[#allocation2 + $0x78] sm:$0xff] %vm1034_vm1, %v4788_v22  ;;  %v5261_v28 = vld [vmem:[%s6273_s4] ss:$0 sm:$0xff]  ;;  %s5273_s2 = scalar_select %p844_p11, 1, 0 }
  0xa4   : > { %4112 = vmatprep.subr.mxu1 %v570_v1  ;;  %4087 = vmatmul.mubr.msk.f32.vlgmr.msra.gmra.mxu0 %vm590_vm0, %v575_v7  ;;  %1052 = vst.msk [vmem:[#allocation2 + $0x80] sm:$0xff] %vm1034_vm1, %v4788_v22  ;;  %1054 = vst.msk [vmem:[#allocation2 + $0x90] sm:$0xff] %vm1034_vm1, %v4788_v22  ;;  %p847_p4 = scmp.lt.s32.totalorder %s6271_s18, 1  ;;  %s6274_s4 = sld [smem:[#allocation59_spill]] }
  0xa5   : > { %4113 = vmatpush3.msra.mxu1 %v570_v1  ;;  %4089 = vmatprep.mubr.msk.f32.mxu0 %vm590_vm0, %v576_v9  ;;  %1053 = vst.msk [vmem:[#allocation2 + $0x88] sm:$0x3] %vm1037_vm2, %v4788_v22  ;;  %1059 = vst.msk [vmem:[#allocation2 + $0xb8] sm:$0x3] %vm1037_vm2, %v4788_v22  ;;  %s846_s19 = scvt.s32.f32 %s5273_s2  ;;  %s6333_s20 = sld [smem:[#allocation18_spill]] }
  0xa6   : > { %4105 = vmatmul.mubr.msk.f32.gmra.mxu1 %vm590_vm0, %v587_v6  ;;  %4117 = vmatprep.subr.mxu1 %v571_v0  ;;  %1057 = vst.msk [vmem:[#allocation2 + $0xa8] sm:$0xff] %vm1034_vm1, %v4788_v22  ;;  %1058 = vst.msk [vmem:[#allocation2 + $0xb0] sm:$0xff] %vm1034_vm1, %v4788_v22  ;;  %s5292_s26 = scalar_select %p847_p4, 1, 0 }
  0xa7   : > { %4107 = vmatprep.mubr.msk.f32.mxu1 %vm590_vm0, %v588_v8  ;;  %1060 = vst.msk [vmem:[#allocation2 + $0xc0] sm:$0xff] %vm1034_vm1, %v4788_v22  ;;  %1061 = vst.msk [vmem:[#allocation2 + $0xc8] sm:$0xff] %vm1034_vm1, %v4788_v22  ;;  %4150 = vmatprep.subr.msk.mxu0 %vm1171_vm3, %v1104_v24  ;;  %s3885_s9 = sshll.u32 %s6271_s18, 4 }
  0xa8   : > { %4090 = vmatmul.mubr.msk.f32.gmra.mxu0 %vm590_vm0, %v577_v11  ;;  %1062 = vst.msk [vmem:[#allocation2 + $0xd0] sm:$0x3] %vm1037_vm2, %v4788_v22  ;;  %1065 = vst.msk [vmem:[#allocation2 + $0xe8] sm:$0x3] %vm1037_vm2, %v4788_v22  ;;  %s849_s12 = scvt.s32.f32 %s5292_s26  ;;  %s6302_s26 = sld [smem:[#allocation62_spill]] }
  0xa9   : > { %4092 = vmatprep.mubr.msk.f32.mxu0 %vm590_vm0, %v578_v13  ;;  %1063 = vst.msk [vmem:[#allocation2 + $0xd8] sm:$0xff] %vm1034_vm1, %v4788_v22  ;;  %1064 = vst.msk [vmem:[#allocation2 + $0xe0] sm:$0xff] %vm1034_vm1, %v4788_v22  ;;  %4151 = vmatpush3.msk.msra.mxu0 %vm1171_vm3, %v1104_v24  ;;  %v939_v13 = vstv %s846_s19 }
  0xaa   : > { %4108 = vmatmul.mubr.msk.f32.gmra.mxu1 %vm590_vm0, %v589_v10  ;;  %4202 = vmatprep.subr.msk.mxu0 %vm1171_vm3, %v5249_v26 }
  0xab   : > { %4114 = vmatprep.mubr.msk.f32.mxu1 %vm590_vm0, %v850_v12  ;;  %s3874_s1 = sshll.u32 %s6333_s20, 5 }
  0xac   : > { %4093 = vmatmul.mubr.msk.f32.gmra.mxu0 %vm590_vm0, %v579_v15  ;;  %s3494_s17 = sadd.s32 %s3885_s9, %s3874_s1 }
  0xad   : > { %4095 = vmatprep.mubr.msk.f32.mxu0 %vm590_vm0, %v580_v16  ;;  %s3875_s18 = sshll.u32 %s3494_s17, 7 }
  0xae   : > { %4115 = vmatmul.mubr.msk.f32.vlgmr.msra.gmra.mxu1 %vm590_vm0, %v851_v14 }
  0xaf   : > { %4118 = vmatpush3.msra.mxu1 %v571_v0  ;;  %4121 = vmatprep.mubr.msk.f32.mxu1 %vm590_vm0, %v942_v17 }
  0xb0   : > { %4119 = vmatprep.subr.mxu1 %v570_v1  ;;  %4096 = vmatmul.mubr.msk.f32.gmra.mxu0 %vm590_vm0, %v581_v18 }
  0xb1   : > { %4120 = vmatpush3.msra.mxu1 %v570_v1  ;;  %4098 = vmatprep.mubr.msk.f32.mxu0 %vm590_vm0, %v582_v20 }
  0xb2   : > { %4122 = vmatmul.mubr.msk.f32.vlgmr.msra.gmra.mxu1 %vm590_vm0, %v943_v19  ;;  %4124 = vmatprep.subr.msk.mxu1 %vm1171_vm3, %v3689_v23 }
  0xb3   : > { %4125 = vmatpush3.msk.msra.mxu1 %vm1171_vm3, %v3689_v23 }
  0xb4   : > { %4099 = vmatmul.mubr.msk.f32.gmra.mxu0 %vm590_vm0, %v583_v21  ;;  %4176 = vmatprep.subr.msk.mxu1 %vm1171_vm3, %v5242_v25 }
 0x162   : > { %v4103_v29 = vpop.f32.mrf.mxu1 }
 0x163   : > { %v801_v30 = vmul.f32 %v4103_v29, %v5256_v27 }
 0x164   : > { %v755_v31 = vpop.f32.mrf.mxu1  ;;  %v4088_v35 = vpop.f32.mrf.mxu0 }
 0x165   : > { %v823_v32 = vadd.f32 %v5261_v28, %v801_v30  ;;  %v800_v33 = vmul.f32 %v5256_v27, %v755_v31  ;;  %v791_v39 = vmul.f32 %v4088_v35, %v5256_v27 }
 0x166   : > { %v4106_v34 = vpop.f32.mrf.mxu1  ;;  %v705_v41 = vpop.f32.mrf.mxu0 }
 0x167   : > { %v839_v36 = vmax.f32 %v823_v32, 0.0  ;;  %v822_v37 = vadd.f32 %v5261_v28, %v800_v33  ;;  %v803_v38 = vmul.f32 %v4106_v34, %v5256_v27  ;;  %v813_v45 = vadd.f32 %v5261_v28, %v791_v39 }
 0x168   : > { %v765_v40 = vpop.f32.mrf.mxu1  ;;  %v790_v47 = vmul.f32 %v5256_v27, %v705_v41  ;;  %v4091_v48 = vpop.f32.mrf.mxu0 }
 0x169   : > { %1078 = vst.msk [vmem:[#allocation2 + $0x99] sm:$0xff] %vm1034_vm1, %v839_v36  ;;  %v838_v42 = vmax.f32 %v822_v37, 0.0  ;;  %v825_v43 = vadd.f32 %v5261_v28, %v803_v38  ;;  %v802_v44 = vmul.f32 %v5256_v27, %v765_v40  ;;  %v829_v52 = vmax.f32 %v813_v45, 0.0 }
 0x16a   : > { %v4109_v46 = vpop.f32.mrf.mxu1  ;;  %v812_v54 = vadd.f32 %v5261_v28, %v790_v47  ;;  %v793_v55 = vmul.f32 %v4091_v48, %v5256_v27  ;;  %v715_v56 = vpop.f32.mrf.mxu0  ;;  %v1031_v37 = vstv %s849_s12 }
 0x16b   : > { %1077 = vst.msk [vmem:[#allocation2 + $0x91] sm:$0xff] %vm1034_vm1, %v838_v42  ;;  %v841_v49 = vmax.f32 %v825_v43, 0.0  ;;  %v824_v50 = vadd.f32 %v5261_v28, %v802_v44  ;;  %v805_v51 = vmul.f32 %v4109_v46, %v5256_v27  ;;  %1068 = vst.msk [vmem:[#allocation2 + $0x21] sm:$0xff] %vm1034_vm1, %v829_v52  ;;  %v792_v60 = vmul.f32 %v5256_v27, %v715_v56 }
 0x16c   : > { %v775_v53 = vpop.f32.mrf.mxu1  ;;  %v828_v62 = vmax.f32 %v812_v54, 0.0  ;;  %v815_v63 = vadd.f32 %v5261_v28, %v793_v55  ;;  %v4094_v0 = vpop.f32.mrf.mxu0 }
 0x16d   : > { %1080 = vst.msk [vmem:[#allocation2 + $0xb1] sm:$0xff] %vm1034_vm1, %v841_v49  ;;  %v840_v57 = vmax.f32 %v824_v50, 0.0  ;;  %v827_v58 = vadd.f32 %v5261_v28, %v805_v51  ;;  %v804_v59 = vmul.f32 %v5256_v27, %v775_v53  ;;  %v814_v4 = vadd.f32 %v5261_v28, %v792_v60  ;;  %v5349_v60 = vld [vmem:[%s6270_s10 + $0x14] sm:$0xf] }
 0x16e   : > { %v4116_v61 = vpop.f32.mrf.mxu1  ;;  %1067 = vst.msk [vmem:[#allocation2 + $0x19] sm:$0xff] %vm1034_vm1, %v828_v62  ;;  %v831_v6 = vmax.f32 %v815_v63, 0.0  ;;  %v795_v7 = vmul.f32 %v4094_v0, %v5256_v27  ;;  %v725_v8 = vpop.f32.mrf.mxu0 }
 0x16f   : > { %1079 = vst.msk [vmem:[#allocation2 + $0xa9] sm:$0xff] %vm1034_vm1, %v840_v57  ;;  %v843_v1 = vmax.f32 %v827_v58, 0.0  ;;  %v826_v2 = vadd.f32 %v5261_v28, %v804_v59  ;;  %v934_v3 = vmul.f32 %v4116_v61, %v5256_v27  ;;  %v830_v12 = vmax.f32 %v814_v4, 0.0  ;;  %v5344_v59 = vld [vmem:[%s6270_s10 + $0x10] sm:$0xf] }
 0x170   : > { %v924_v5 = vpop.f32.mrf.mxu1  ;;  %1070 = vst.msk [vmem:[#allocation2 + $0x39] sm:$0xff] %vm1034_vm1, %v831_v6  ;;  %v817_v14 = vadd.f32 %v5261_v28, %v795_v7  ;;  %v794_v15 = vmul.f32 %v5256_v27, %v725_v8  ;;  %v4097_v16 = vpop.f32.mrf.mxu0 }
 0x171   : > { %1082 = vst.msk [vmem:[#allocation2 + $0xc9] sm:$0xff] %vm1034_vm1, %v843_v1  ;;  %v842_v9 = vmax.f32 %v826_v2, 0.0  ;;  %v936_v10 = vadd.f32 %v5261_v28, %v934_v3  ;;  %v933_v11 = vmul.f32 %v5256_v27, %v924_v5  ;;  %1069 = vst.msk [vmem:[#allocation2 + $0x31] sm:$0xff] %vm1034_vm1, %v830_v12  ;;  %v797_v20 = vmul.f32 %v4097_v16, %v5256_v27 }
 0x172   : > { %v4123_v17 = vpop.f32.mrf.mxu1  ;;  %v833_v22 = vmax.f32 %v817_v14, 0.0  ;;  %v816_v23 = vadd.f32 %v5261_v28, %v794_v15  ;;  %v735_v24 = vpop.f32.mrf.mxu0  ;;  %v5363_v63 = vld [vmem:[#allocation2 + $0x21] sm:$0xff]  ;;  %v5434_v14 = vld [vmem:[#allocation2 + $0x90] sm:$0xff]  ;;  %v5440_v15 = vld [vmem:[#allocation2 + $0x99] sm:$0xff] }
 0x173   : > { %1081 = vst.msk [vmem:[#allocation2 + $0xc1] sm:$0xff] %vm1034_vm1, %v842_v9  ;;  %v938_v18 = vmax.f32 %v936_v10, 0.0  ;;  %v935_v19 = vadd.f32 %v5261_v28, %v933_v11  ;;  %v1026_v21 = vmul.f32 %v4123_v17, %v5256_v27  ;;  %v819_v32 = vadd.f32 %v5261_v28, %v797_v20  ;;  %v5442_v16 = vld [vmem:[#allocation2 + $0x98] sm:$0xff] }
 0x174   : > { %v1016_v29 = vpop.f32.mrf.mxu1  ;;  %v796_v33 = vmul.f32 %v5256_v27, %v735_v24  ;;  %1072 = vst.msk [vmem:[#allocation2 + $0x51] sm:$0xff] %vm1034_vm1, %v833_v22  ;;  %v832_v34 = vmax.f32 %v816_v23, 0.0  ;;  %v4100_v35 = vpop.f32.mrf.mxu0  ;;  %v3796_v24 = vld [vmem:[%s6270_s10 + $0x18] sm:$0xf] }
 0x175   : > { %v941_v30 = vmul.f32 %v939_v13, %v938_v18  ;;  %v937_v31 = vmax.f32 %v935_v19, 0.0  ;;  %v1028_v36 = vadd.f32 %v5261_v28, %v1026_v21  ;;  %v1025_v38 = vmul.f32 %v5256_v27, %v1016_v29  ;;  %v5332_v55 = vld [vmem:[#allocation2 + $0x19] sm:$0xff]  ;;  %v5456_v19 = vld [vmem:[#allocation2 + $0xb1] sm:$0xff] }
 0x176   : > { %v835_v40 = vmax.f32 %v819_v32, 0.0  ;;  %v818_v41 = vadd.f32 %v5261_v28, %v796_v33  ;;  %v799_v42 = vmul.f32 %v4100_v35, %v5256_v27  ;;  %1071 = vst.msk [vmem:[#allocation2 + $0x49] sm:$0xff] %vm1034_vm1, %v832_v34  ;;  %v745_v43 = vpop.f32.mrf.mxu0  ;;  %v5337_v58 = vld [vmem:[#allocation2 + $0x18] sm:$0xff]  ;;  %v1091_v0 = vld [vmem:[#allocation2 + $0x20] sm:$0xff]  ;;  %v5448_v17 = vld [vmem:[#allocation2 + $0xa9] sm:$0xff] }
 0x177   : > { %1084 = vst.msk [vmem:[#allocation2 + $0x9] sm:$0xff] %vm1034_vm1, %v941_v30  ;;  %v940_v39 = vmul.f32 %v939_v13, %v937_v31  ;;  %v1030_v44 = vmax.f32 %v1028_v36, 0.0  ;;  %v1027_v45 = vadd.f32 %v5261_v28, %v1025_v38  ;;  %v798_v48 = vmul.f32 %v5256_v27, %v745_v43  ;;  %v5380_v1 = vld [vmem:[#allocation2 + $0x39] sm:$0xff]  ;;  %v5432_v13 = vld [vmem:[#allocation2 + $0x91] sm:$0xff]  ;;  %v5450_v18 = vld [vmem:[#allocation2 + $0xa8] sm:$0xff] }
 0x178   : > { %1074 = vst.msk [vmem:[#allocation2 + $0x69] sm:$0xff] %vm1034_vm1, %v835_v40  ;;  %v834_v46 = vmax.f32 %v818_v41, 0.0  ;;  %v821_v47 = vadd.f32 %v5261_v28, %v799_v42  ;;  %v5357_v61 = vld [vmem:[#allocation2 + $0x31] sm:$0xff]  ;;  %v1518_v23 = vld [vmem:[#allocation2 + $0x1a] sm:$0xff]  ;;  %v1519_v30 = vld [vmem:[#allocation2 + $0x22] sm:$0xff] }
 0x179   : > { %1083 = vst.msk [vmem:[#allocation2 + $0x1] sm:$0xff] %vm1034_vm1, %v940_v39  ;;  %v1033_v49 = vmul.f32 %v1031_v37, %v1030_v44  ;;  %v1029_v50 = vmax.f32 %v1027_v45, 0.0  ;;  %v820_v52 = vadd.f32 %v5261_v28, %v798_v48  ;;  %v5359_v62 = vld [vmem:[#allocation2 + $0x30] sm:$0xff]  ;;  %v5382_v2 = vld [vmem:[#allocation2 + $0x38] sm:$0xff]  ;;  %v3832_v45 = vld [vmem:[%s6270_s10 + $0x20] sm:$0xf] }
 0x17a   : > { %1073 = vst.msk [vmem:[#allocation2 + $0x61] sm:$0xff] %vm1034_vm1, %v834_v46  ;;  %v837_v51 = vmax.f32 %v821_v47, 0.0  ;;  %v5458_v20 = vld [vmem:[#allocation2 + $0xb0] sm:$0xff]  ;;  %v3814_v29 = vld [vmem:[%s6270_s10 + $0x1c] sm:$0xf]  ;;  %v5549_v42 = vld [vmem:[#allocation2 + $0xc0] sm:$0xff] }
 0x17b   : > { %1087 = vst.msk [vmem:[#allocation2 + $0xe1] sm:$0xff] %vm1034_vm1, %v1033_v49  ;;  %v1032_v53 = vmul.f32 %v1031_v37, %v1029_v50  ;;  %v836_v54 = vmax.f32 %v820_v52, 0.0  ;;  %v5396_v5 = vld [vmem:[#allocation2 + $0x51] sm:$0xff]  ;;  %v5493_v32 = vld [vmem:[#allocation2 + $0x3a] sm:$0xff]  ;;  %v5557_v44 = vld [vmem:[#allocation2 + $0xc8] sm:$0xff] }
 0x17c   : > { %1076 = vst.msk [vmem:[#allocation2 + $0x81] sm:$0xff] %vm1034_vm1, %v837_v51  ;;  %v5487_v31 = vld [vmem:[#allocation2 + $0x32] sm:$0xff]  ;;  %v5541_v40 = vld [vmem:[#allocation2 + $0x9a] sm:$0xff]  ;;  %v5547_v41 = vld [vmem:[#allocation2 + $0xaa] sm:$0xff] }
 0x17d   : > { %1086 = vst.msk [vmem:[#allocation2 + $0xd9] sm:$0xff] %vm1034_vm1, %v1032_v53  ;;  %1075 = vst.msk [vmem:[#allocation2 + $0x79] sm:$0xff] %vm1034_vm1, %v836_v54  ;;  %v5398_v6 = vld [vmem:[#allocation2 + $0x50] sm:$0xff]  ;;  %v1990_v46 = vld [vmem:[#allocation2 + $0xc1] sm:$0xff] }
 0x17e   : > { %v1106_v28 = vld [vmem:[#allocation2 + $0x9] sm:$0xff]  ;;  %v5505_v34 = vld [vmem:[#allocation2 + $0x52] sm:$0xff] }
 0x17f   : > { %v5412_v9 = vld [vmem:[#allocation2 + $0x69] sm:$0xff]  ;;  %v5535_v39 = vld [vmem:[#allocation2 + $0x92] sm:$0xff] }
 0x180   : > { %v1105_v27 = vld [vmem:[#allocation2 + $0x1] sm:$0xff]  ;;  %v1517_v22 = vld [vmem:[#allocation2 + $0xa] sm:$0xff]  ;;  %v5555_v43 = vld [vmem:[#allocation2 + $0xb2] sm:$0xff] }
 0x181   : > { %v1088_v56 = vld [vmem:[#allocation2] sm:$0xff]  ;;  %v1089_v57 = vld [vmem:[#allocation2 + $0x8] sm:$0xff]  ;;  %4126 = vmatprep.mubr.msk.f32.mxu1 %vm1034_vm1, %v1105_v27 }
 0x182   : > { %4152 = vmatprep.mubr.msk.f32.mxu0 %vm1034_vm1, %v1088_v56  ;;  %4127 = vmatmul.mubr.msk.f32.vlgmr.msra.gmra.mxu1 %vm1034_vm1, %v1106_v28  ;;  %v5392_v3 = vld [vmem:[#allocation2 + $0x61] sm:$0xff]  ;;  %v5499_v33 = vld [vmem:[#allocation2 + $0x4a] sm:$0xff] }
 0x183   : > { %4153 = vmatmul.mubr.msk.f32.vlgmr.msra.gmra.mxu0 %vm1034_vm1, %v1089_v57  ;;  %4177 = vmatpush3.msk.msra.mxu1 %vm1171_vm3, %v5242_v25  ;;  %v5376_v25 = vld [vmem:[#allocation2 + $0x49] sm:$0xff]  ;;  %v5394_v4 = vld [vmem:[#allocation2 + $0x60] sm:$0xff] }
 0x184   : > { %4129 = vmatprep.mubr.msk.f32.mxu1 %vm1034_vm1, %v5332_v55  ;;  %4155 = vmatprep.mubr.msk.f32.mxu0 %vm1034_vm1, %v5337_v58  ;;  %v5408_v7 = vld [vmem:[#allocation2 + $0x79] sm:$0xff]  ;;  %v5414_v10 = vld [vmem:[#allocation2 + $0x68] sm:$0xff] }
 0x185   : > { %4203 = vmatpush3.msk.msra.mxu0 %vm1171_vm3, %v5249_v26  ;;  %4228 = vmatprep.subr.msk.mxu1 %vm1171_vm3, %v5344_v59  ;;  %v5378_v26 = vld [vmem:[#allocation2 + $0x48] sm:$0xff]  ;;  %v5410_v8 = vld [vmem:[#allocation2 + $0x78] sm:$0xff]  ;;  %v5426_v12 = vld [vmem:[#allocation2 + $0x80] sm:$0xff] }
 0x186   : > { %4254 = vmatprep.subr.msk.mxu0 %vm1171_vm3, %v5349_v60  ;;  %4130 = vmatmul.mubr.msk.f32.gmra.mxu1 %vm1034_vm1, %v5363_v63  ;;  %v5424_v11 = vld [vmem:[#allocation2 + $0x81] sm:$0xff]  ;;  %v5517_v36 = vld [vmem:[#allocation2 + $0x6a] sm:$0xff]  ;;  %v2451_v50 = vld [vmem:[#allocation2 + $0xd8] sm:$0xff] }
 0x187   : > { %4156 = vmatmul.mubr.msk.f32.gmra.mxu0 %vm1034_vm1, %v1091_v0  ;;  %4132 = vmatprep.mubr.msk.f32.mxu1 %vm1034_vm1, %v5357_v61  ;;  %v1516_v21 = vld [vmem:[#allocation2 + $0x2] sm:$0xff]  ;;  %v5523_v37 = vld [vmem:[#allocation2 + $0x7a] sm:$0xff]  ;;  %v2221_v49 = vld [vmem:[#allocation2 + $0xca] sm:$0xff] }
 0x188   : > { %4158 = vmatprep.mubr.msk.f32.mxu0 %vm1034_vm1, %v5359_v62  ;;  %v5511_v35 = vld [vmem:[#allocation2 + $0x62] sm:$0xff]  ;;  %v2681_v51 = vld [vmem:[#allocation2 + $0xd9] sm:$0xff] }
 0x189   : > { %v5529_v38 = vld [vmem:[#allocation2 + $0x82] sm:$0xff]  ;;  %v2911_v54 = vld [vmem:[#allocation2 + $0xda] sm:$0xff] }
 0x18a   : > { %4133 = vmatmul.mubr.msk.f32.gmra.mxu1 %vm1034_vm1, %v5380_v1  ;;  %v2220_v47 = vld [vmem:[#allocation2 + $0xc2] sm:$0xff] }
 0x18b   : > { %4159 = vmatmul.mubr.msk.f32.gmra.mxu0 %vm1034_vm1, %v5382_v2  ;;  %4135 = vmatprep.mubr.msk.f32.mxu1 %vm1034_vm1, %v5376_v25  ;;  %v1991_v48 = vld [vmem:[#allocation2 + $0xc9] sm:$0xff]  ;;  %v2452_v52 = vld [vmem:[#allocation2 + $0xe0] sm:$0xff] }
 0x18c   : > { %4161 = vmatprep.mubr.msk.f32.mxu0 %vm1034_vm1, %v5378_v26  ;;  %v2682_v53 = vld [vmem:[#allocation2 + $0xe1] sm:$0xff] }
 0x18d   : > { %v3189_v27 = vld [vmem:[%s6274_s4] sm:$0xf]  ;;  %s3497_s4 = sshll.u32 %s6020_s6, 4  ;;  %s6097_s4 = int_to_ptr.vmem [resolvable:$true] %s3497_s4 }
 0x18e   : > { %4136 = vmatmul.mubr.msk.f32.gmra.mxu1 %vm1034_vm1, %v5396_v5  ;;  %s4629_s29 = scalar_lea.vmem %s6097_s4, 2048 }
 0x18f   : > { %4162 = vmatmul.mubr.msk.f32.gmra.mxu0 %vm1034_vm1, %v5398_v6  ;;  %4138 = vmatprep.mubr.msk.f32.mxu1 %vm1034_vm1, %v5392_v3  ;;  %p4630_p12 = scmp.ne.s32.totalorder %s6097_s4, %s4629_s29 }
 0x190   : > { %4164 = vmatprep.mubr.msk.f32.mxu0 %vm1034_vm1, %v5394_v4 }
 0x191   : > { %p4631_p9 = pnand %p4630_p12, %p6336_p7 }
 0x192   : > { %4139 = vmatmul.mubr.msk.f32.gmra.mxu1 %vm1034_vm1, %v5412_v9 }
 0x193   : > { %4165 = vmatmul.mubr.msk.f32.gmra.mxu0 %vm1034_vm1, %v5414_v10  ;;  %4141 = vmatprep.mubr.msk.f32.mxu1 %vm1034_vm1, %v5408_v7  ;;  %p4632_p3 = pneg %p4631_p9 }
 0x194   : > { %4167 = vmatprep.mubr.msk.f32.mxu0 %vm1034_vm1, %v5410_v8 }
 0x196   : > { %4142 = vmatmul.mubr.msk.f32.gmra.mxu1 %vm1034_vm1, %v5424_v11 }
 0x197   : > { %4168 = vmatmul.mubr.msk.f32.gmra.mxu0 %vm1034_vm1, %v5426_v12  ;;  %4144 = vmatprep.mubr.msk.f32.mxu1 %vm1034_vm1, %v5432_v13 }
 0x198   : > { %4170 = vmatprep.mubr.msk.f32.mxu0 %vm1034_vm1, %v5434_v14 }
 0x19a   : > { %4145 = vmatmul.mubr.msk.f32.gmra.mxu1 %vm1034_vm1, %v5440_v15 }
 0x19b   : > { %4171 = vmatmul.mubr.msk.f32.gmra.mxu0 %vm1034_vm1, %v5442_v16  ;;  %4147 = vmatprep.mubr.msk.f32.mxu1 %vm1034_vm1, %v5448_v17 }
 0x19c   : > { %4173 = vmatprep.mubr.msk.f32.mxu0 %vm1034_vm1, %v5450_v18 }
 0x19e   : > { %4148 = vmatmul.mubr.msk.f32.gmra.mxu1 %vm1034_vm1, %v5456_v19 }
 0x19f   : > { %4174 = vmatmul.mubr.msk.f32.gmra.mxu0 %vm1034_vm1, %v5458_v20  ;;  %4178 = vmatprep.mubr.msk.f32.mxu1 %vm1034_vm1, %v1516_v21 }
 0x1a0   : > { %4204 = vmatprep.mubr.msk.f32.mxu0 %vm1034_vm1, %v5337_v58 }
 0x1a2   : > { %4179 = vmatmul.mubr.msk.f32.vlgmr.msra.gmra.mxu1 %vm1034_vm1, %v1517_v22 }
 0x1a3   : > { %4205 = vmatmul.mubr.msk.f32.vlgmr.msra.gmra.mxu0 %vm1034_vm1, %v1091_v0  ;;  %4181 = vmatprep.mubr.msk.f32.mxu1 %vm1034_vm1, %v1518_v23 }
 0x1a4   : > { %4207 = vmatprep.mubr.msk.f32.mxu0 %vm1034_vm1, %v5359_v62  ;;  %4229 = vmatpush3.msk.msra.mxu1 %vm1171_vm3, %v5344_v59 }
 0x1a5   : > { %4255 = vmatpush3.msk.msra.mxu0 %vm1171_vm3, %v5349_v60  ;;  %4280 = vmatprep.subr.msk.mxu1 %vm1171_vm3, %v3796_v24 }
 0x1a6   : > { %4306 = vmatprep.subr.msk.mxu0 %vm1171_vm3, %v3814_v29  ;;  %4182 = vmatmul.mubr.msk.f32.gmra.mxu1 %vm1034_vm1, %v1519_v30 }
 0x1a7   : > { %4208 = vmatmul.mubr.msk.f32.gmra.mxu0 %vm1034_vm1, %v5382_v2  ;;  %4184 = vmatprep.mubr.msk.f32.mxu1 %vm1034_vm1, %v5487_v31 }
 0x1a8   : > { %4210 = vmatprep.mubr.msk.f32.mxu0 %vm1034_vm1, %v5378_v26 }
 0x1aa   : > { %4185 = vmatmul.mubr.msk.f32.gmra.mxu1 %vm1034_vm1, %v5493_v32 }
 0x1ab   : > { %4211 = vmatmul.mubr.msk.f32.gmra.mxu0 %vm1034_vm1, %v5398_v6  ;;  %4187 = vmatprep.mubr.msk.f32.mxu1 %vm1034_vm1, %v5499_v33 }
 0x1ac   : > { %4213 = vmatprep.mubr.msk.f32.mxu0 %vm1034_vm1, %v5394_v4 }
 0x1ae   : > { %4188 = vmatmul.mubr.msk.f32.gmra.mxu1 %vm1034_vm1, %v5505_v34 }
 0x1af   : > { %4214 = vmatmul.mubr.msk.f32.gmra.mxu0 %vm1034_vm1, %v5414_v10  ;;  %4190 = vmatprep.mubr.msk.f32.mxu1 %vm1034_vm1, %v5511_v35 }
 0x1b0   : > { %4216 = vmatprep.mubr.msk.f32.mxu0 %vm1034_vm1, %v5410_v8 }
 0x1b2   : > { %4191 = vmatmul.mubr.msk.f32.gmra.mxu1 %vm1034_vm1, %v5517_v36 }
 0x1b3   : > { %4217 = vmatmul.mubr.msk.f32.gmra.mxu0 %vm1034_vm1, %v5426_v12  ;;  %4193 = vmatprep.mubr.msk.f32.mxu1 %vm1034_vm1, %v5523_v37 }
 0x1b4   : > { %4219 = vmatprep.mubr.msk.f32.mxu0 %vm1034_vm1, %v5434_v14 }
 0x1b6   : > { %4194 = vmatmul.mubr.msk.f32.gmra.mxu1 %vm1034_vm1, %v5529_v38 }
 0x1b7   : > { %4220 = vmatmul.mubr.msk.f32.gmra.mxu0 %vm1034_vm1, %v5442_v16  ;;  %4196 = vmatprep.mubr.msk.f32.mxu1 %vm1034_vm1, %v5535_v39 }
 0x1b8   : > { %4222 = vmatprep.mubr.msk.f32.mxu0 %vm1034_vm1, %v5450_v18 }
 0x1ba   : > { %4197 = vmatmul.mubr.msk.f32.gmra.mxu1 %vm1034_vm1, %v5541_v40 }
 0x1bb   : > { %4223 = vmatmul.mubr.msk.f32.gmra.mxu0 %vm1034_vm1, %v5458_v20  ;;  %4199 = vmatprep.mubr.msk.f32.mxu1 %vm1034_vm1, %v5547_v41 }
 0x1bc   : > { %4225 = vmatprep.mubr.msk.f32.mxu0 %vm1034_vm1, %v5549_v42 }
 0x1be   : > { %4200 = vmatmul.mubr.msk.f32.gmra.mxu1 %vm1034_vm1, %v5555_v43 }
 0x1bf   : > { %4226 = vmatmul.mubr.msk.f32.gmra.mxu0 %vm1034_vm1, %v5557_v44  ;;  %4230 = vmatprep.mubr.msk.f32.mxu1 %vm1034_vm1, %v5332_v55  ;;  %v2912_v55 = vld [vmem:[#allocation2 + $0xe2] sm:$0xff] }
 0x1c0   : > { %4256 = vmatprep.mubr.msk.f32.mxu0 %vm1034_vm1, %v1518_v23 }
 0x1c2   : > { %4231 = vmatmul.mubr.msk.f32.vlgmr.msra.gmra.mxu1 %vm1034_vm1, %v5363_v63 }
 0x1c3   : > { %4257 = vmatmul.mubr.msk.f32.vlgmr.msra.gmra.mxu0 %vm1034_vm1, %v1519_v30  ;;  %4233 = vmatprep.mubr.msk.f32.mxu1 %vm1034_vm1, %v5357_v61 }
 0x1c4   : > { %4259 = vmatprep.mubr.msk.f32.mxu0 %vm1034_vm1, %v5487_v31  ;;  %4281 = vmatpush3.msk.msra.mxu1 %vm1171_vm3, %v3796_v24 }
 0x1c5   : > { %4307 = vmatpush3.msk.msra.mxu0 %vm1171_vm3, %v3814_v29  ;;  %4332 = vmatprep.subr.msk.mxu1 %vm1171_vm3, %v3832_v45 }
 0x1c6   : > { %4234 = vmatmul.mubr.msk.f32.gmra.mxu1 %vm1034_vm1, %v5380_v1  ;;  %4358 = vmatprep.subr.msk.mxu0 %vm1171_vm3, %v3189_v27 }
 0x1c7   : > { %4260 = vmatmul.mubr.msk.f32.gmra.mxu0 %vm1034_vm1, %v5493_v32  ;;  %4236 = vmatprep.mubr.msk.f32.mxu1 %vm1034_vm1, %v5376_v25 }
 0x1c8   : > { %4262 = vmatprep.mubr.msk.f32.mxu0 %vm1034_vm1, %v5499_v33 }
 0x1ca   : > { %4237 = vmatmul.mubr.msk.f32.gmra.mxu1 %vm1034_vm1, %v5396_v5 }
 0x1cb   : > { %4263 = vmatmul.mubr.msk.f32.gmra.mxu0 %vm1034_vm1, %v5505_v34  ;;  %4239 = vmatprep.mubr.msk.f32.mxu1 %vm1034_vm1, %v5392_v3 }
 0x1cc   : > { %4265 = vmatprep.mubr.msk.f32.mxu0 %vm1034_vm1, %v5511_v35 }
 0x1ce   : > { %4240 = vmatmul.mubr.msk.f32.gmra.mxu1 %vm1034_vm1, %v5412_v9 }
 0x1cf   : > { %4266 = vmatmul.mubr.msk.f32.gmra.mxu0 %vm1034_vm1, %v5517_v36  ;;  %4242 = vmatprep.mubr.msk.f32.mxu1 %vm1034_vm1, %v5408_v7 }
 0x1d0   : > { %4268 = vmatprep.mubr.msk.f32.mxu0 %vm1034_vm1, %v5523_v37 }
 0x1d2   : > { %4243 = vmatmul.mubr.msk.f32.gmra.mxu1 %vm1034_vm1, %v5424_v11 }
 0x1d3   : > { %4269 = vmatmul.mubr.msk.f32.gmra.mxu0 %vm1034_vm1, %v5529_v38  ;;  %4245 = vmatprep.mubr.msk.f32.mxu1 %vm1034_vm1, %v5432_v13 }
 0x1d4   : > { %4271 = vmatprep.mubr.msk.f32.mxu0 %vm1034_vm1, %v5535_v39 }
 0x1d6   : > { %4246 = vmatmul.mubr.msk.f32.gmra.mxu1 %vm1034_vm1, %v5440_v15 }
 0x1d7   : > { %4272 = vmatmul.mubr.msk.f32.gmra.mxu0 %vm1034_vm1, %v5541_v40  ;;  %4248 = vmatprep.mubr.msk.f32.mxu1 %vm1034_vm1, %v5448_v17 }
 0x1d8   : > { %4274 = vmatprep.mubr.msk.f32.mxu0 %vm1034_vm1, %v5547_v41 }
 0x1da   : > { %4249 = vmatmul.mubr.msk.f32.gmra.mxu1 %vm1034_vm1, %v5456_v19 }
 0x1db   : > { %4275 = vmatmul.mubr.msk.f32.gmra.mxu0 %vm1034_vm1, %v5555_v43  ;;  %4251 = vmatprep.mubr.msk.f32.mxu1 %vm1034_vm1, %v1990_v46 }
 0x1dc   : > { %4277 = vmatprep.mubr.msk.f32.mxu0 %vm1034_vm1, %v2220_v47 }
 0x1de   : > { %4252 = vmatmul.mubr.msk.f32.gmra.mxu1 %vm1034_vm1, %v1991_v48 }
 0x1df   : > { %4278 = vmatmul.mubr.msk.f32.gmra.mxu0 %vm1034_vm1, %v2221_v49  ;;  %4282 = vmatprep.mubr.msk.f32.mxu1 %vm1034_vm1, %v5359_v62 }
 0x1e0   : > { %4308 = vmatprep.mubr.msk.f32.mxu0 %vm1034_vm1, %v5357_v61 }
 0x1e2   : > { %4283 = vmatmul.mubr.msk.f32.vlgmr.msra.gmra.mxu1 %vm1034_vm1, %v5382_v2 }
 0x1e3   : > { %4309 = vmatmul.mubr.msk.f32.vlgmr.msra.gmra.mxu0 %vm1034_vm1, %v5380_v1  ;;  %4285 = vmatprep.mubr.msk.f32.mxu1 %vm1034_vm1, %v5378_v26 }
 0x1e4   : > { %4311 = vmatprep.mubr.msk.f32.mxu0 %vm1034_vm1, %v5376_v25  ;;  %4333 = vmatpush3.msk.msra.mxu1 %vm1171_vm3, %v3832_v45 }
 0x1e5   : > { %4359 = vmatpush3.msk.msra.mxu0 %vm1171_vm3, %v3189_v27 }
 0x1e6   : > { %4286 = vmatmul.mubr.msk.f32.gmra.mxu1 %vm1034_vm1, %v5398_v6 }
 0x1e7   : > { %4312 = vmatmul.mubr.msk.f32.gmra.mxu0 %vm1034_vm1, %v5396_v5  ;;  %4288 = vmatprep.mubr.msk.f32.mxu1 %vm1034_vm1, %v5394_v4 }
 0x1e8   : > { %4314 = vmatprep.mubr.msk.f32.mxu0 %vm1034_vm1, %v5392_v3 }
 0x1ea   : > { %4289 = vmatmul.mubr.msk.f32.gmra.mxu1 %vm1034_vm1, %v5414_v10 }
 0x1eb   : > { %4315 = vmatmul.mubr.msk.f32.gmra.mxu0 %vm1034_vm1, %v5412_v9  ;;  %4291 = vmatprep.mubr.msk.f32.mxu1 %vm1034_vm1, %v5410_v8 }
 0x1ec   : > { %4317 = vmatprep.mubr.msk.f32.mxu0 %vm1034_vm1, %v5408_v7 }
 0x1ee   : > { %4292 = vmatmul.mubr.msk.f32.gmra.mxu1 %vm1034_vm1, %v5426_v12 }
 0x1ef   : > { %4318 = vmatmul.mubr.msk.f32.gmra.mxu0 %vm1034_vm1, %v5424_v11  ;;  %4294 = vmatprep.mubr.msk.f32.mxu1 %vm1034_vm1, %v5434_v14 }
 0x1f0   : > { %4320 = vmatprep.mubr.msk.f32.mxu0 %vm1034_vm1, %v5432_v13 }
 0x1f2   : > { %4295 = vmatmul.mubr.msk.f32.gmra.mxu1 %vm1034_vm1, %v5442_v16 }
 0x1f3   : > { %4321 = vmatmul.mubr.msk.f32.gmra.mxu0 %vm1034_vm1, %v5440_v15  ;;  %4297 = vmatprep.mubr.msk.f32.mxu1 %vm1034_vm1, %v5450_v18 }
 0x1f4   : > { %4323 = vmatprep.mubr.msk.f32.mxu0 %vm1034_vm1, %v5448_v17 }
 0x1f6   : > { %4298 = vmatmul.mubr.msk.f32.gmra.mxu1 %vm1034_vm1, %v5458_v20 }
 0x1f7   : > { %4324 = vmatmul.mubr.msk.f32.gmra.mxu0 %vm1034_vm1, %v5456_v19  ;;  %4300 = vmatprep.mubr.msk.f32.mxu1 %vm1034_vm1, %v5549_v42 }
 0x1f8   : > { %4326 = vmatprep.mubr.msk.f32.mxu0 %vm1034_vm1, %v1990_v46 }
 0x1fa   : > { %4301 = vmatmul.mubr.msk.f32.gmra.mxu1 %vm1034_vm1, %v5557_v44 }
 0x1fb   : > { %4327 = vmatmul.mubr.msk.f32.gmra.mxu0 %vm1034_vm1, %v1991_v48  ;;  %4303 = vmatprep.mubr.msk.f32.mxu1 %vm1034_vm1, %v2451_v50 }
 0x1fc   : > { %4329 = vmatprep.mubr.msk.f32.mxu0 %vm1034_vm1, %v2681_v51 }
 0x1fe   : > { %4304 = vmatmul.mubr.msk.f32.gmra.mxu1 %vm1034_vm1, %v2452_v52 }
 0x1ff   : > { %4330 = vmatmul.mubr.msk.f32.gmra.mxu0 %vm1034_vm1, %v2682_v53  ;;  %4334 = vmatprep.mubr.msk.f32.mxu1 %vm1034_vm1, %v5487_v31 }
 0x202   : > { %4335 = vmatmul.mubr.msk.f32.vlgmr.msra.gmra.mxu1 %vm1034_vm1, %v5493_v32 }
 0x203   : > { %4337 = vmatprep.mubr.msk.f32.mxu1 %vm1034_vm1, %v5499_v33 }
 0x206   : > { %4338 = vmatmul.mubr.msk.f32.gmra.mxu1 %vm1034_vm1, %v5505_v34 }
 0x207   : > { %4340 = vmatprep.mubr.msk.f32.mxu1 %vm1034_vm1, %v5511_v35 }
 0x20a   : > { %4341 = vmatmul.mubr.msk.f32.gmra.mxu1 %vm1034_vm1, %v5517_v36 }
 0x20b   : > { %4343 = vmatprep.mubr.msk.f32.mxu1 %vm1034_vm1, %v5523_v37 }
 0x20e   : > { %4344 = vmatmul.mubr.msk.f32.gmra.mxu1 %vm1034_vm1, %v5529_v38 }
 0x20f   : > { %4346 = vmatprep.mubr.msk.f32.mxu1 %vm1034_vm1, %v5535_v39 }
 0x212   : > { %4347 = vmatmul.mubr.msk.f32.gmra.mxu1 %vm1034_vm1, %v5541_v40 }
 0x213   : > { %4349 = vmatprep.mubr.msk.f32.mxu1 %vm1034_vm1, %v5547_v41 }
 0x216   : > { %4350 = vmatmul.mubr.msk.f32.gmra.mxu1 %vm1034_vm1, %v5555_v43 }
 0x217   : > { %4352 = vmatprep.mubr.msk.f32.mxu1 %vm1034_vm1, %v2220_v47 }
 0x21a   : > { %4353 = vmatmul.mubr.msk.f32.gmra.mxu1 %vm1034_vm1, %v2221_v49 }
 0x21b   : > { %4355 = vmatprep.mubr.msk.f32.mxu1 %vm1034_vm1, %v2911_v54 }
 0x21e   : > { %4356 = vmatmul.mubr.msk.f32.gmra.mxu1 %vm1034_vm1, %v2912_v55 }
 0x242   : > { %v4128_v56 = vpop.f32.mrf.mxu1 }
 0x243   : > { %v4154_v57 = vpop.f32.mrf.mxu0 }
 0x244   : > { %v1443_v28 = vadd.f32 %v4154_v57, %v4128_v56  ;;  %v1241_v58 = vpop.f32.mrf.mxu1 }
 0x245   : > { %v1437_v59 = vpop.f32.mrf.mxu0 }
 0x246   : > { %v1438_v60 = vadd.f32 %v1437_v59, %v1241_v58  ;;  %v4131_v61 = vpop.f32.mrf.mxu1 }
 0x247   : > { %v4157_v62 = vpop.f32.mrf.mxu0 }
 0x248   : > { %v1453_v63 = vadd.f32 %v4157_v62, %v4131_v61  ;;  %v1251_v0 = vpop.f32.mrf.mxu1 }
 0x249   : > { %v1447_v25 = vpop.f32.mrf.mxu0 }
 0x24a   : > { %v1448_v26 = vadd.f32 %v1447_v25, %v1251_v0  ;;  %v4134_v1 = vpop.f32.mrf.mxu1 }
 0x24b   : > { %v4160_v2 = vpop.f32.mrf.mxu0 }
 0x24c   : > { %v1463_v3 = vadd.f32 %v4160_v2, %v4134_v1  ;;  %v1261_v4 = vpop.f32.mrf.mxu1 }
 0x24d   : > { %v1457_v5 = vpop.f32.mrf.mxu0 }
 0x24e   : > { %v1458_v6 = vadd.f32 %v1457_v5, %v1261_v4  ;;  %v4137_v7 = vpop.f32.mrf.mxu1 }
 0x24f   : > { %v4163_v8 = vpop.f32.mrf.mxu0 }
 0x250   : > { %v1473_v9 = vadd.f32 %v4163_v8, %v4137_v7  ;;  %v1271_v10 = vpop.f32.mrf.mxu1 }
 0x251   : > { %v1467_v11 = vpop.f32.mrf.mxu0 }
 0x252   : > { %v1468_v12 = vadd.f32 %v1467_v11, %v1271_v10  ;;  %v4140_v13 = vpop.f32.mrf.mxu1 }
 0x253   : > { %v4166_v14 = vpop.f32.mrf.mxu0 }
 0x254   : > { %v1483_v15 = vadd.f32 %v4166_v14, %v4140_v13  ;;  %v1281_v16 = vpop.f32.mrf.mxu1 }
 0x255   : > { %v1477_v17 = vpop.f32.mrf.mxu0 }
 0x256   : > { %v1478_v18 = vadd.f32 %v1477_v17, %v1281_v16  ;;  %v4143_v19 = vpop.f32.mrf.mxu1 }
 0x257   : > { %v4169_v20 = vpop.f32.mrf.mxu0 }
 0x258   : > { %v1493_v21 = vadd.f32 %v4169_v20, %v4143_v19  ;;  %v1291_v22 = vpop.f32.mrf.mxu1 }
 0x259   : > { %v1487_v23 = vpop.f32.mrf.mxu0 }
 0x25a   : > { %v1488_v24 = vadd.f32 %v1487_v23, %v1291_v22  ;;  %v4146_v29 = vpop.f32.mrf.mxu1 }
 0x25b   : > { %v4172_v30 = vpop.f32.mrf.mxu0 }
 0x25c   : > { %v1503_v31 = vadd.f32 %v4172_v30, %v4146_v29  ;;  %v1301_v32 = vpop.f32.mrf.mxu1 }
 0x25d   : > { %v1497_v33 = vpop.f32.mrf.mxu0 }
 0x25e   : > { %v1498_v34 = vadd.f32 %v1497_v33, %v1301_v32  ;;  %v4149_v35 = vpop.f32.mrf.mxu1 }
 0x25f   : > { %v4175_v36 = vpop.f32.mrf.mxu0 }
 0x260   : > { %v1513_v37 = vadd.f32 %v4175_v36, %v4149_v35  ;;  %v1311_v38 = vpop.f32.mrf.mxu1 }
 0x261   : > { %v1507_v39 = vpop.f32.mrf.mxu0 }
 0x262   : > { %v1508_v40 = vadd.f32 %v1507_v39, %v1311_v38  ;;  %v4180_v41 = vpop.f32.mrf.mxu1 }
 0x263   : > { %v5719_v42 = vpop.f32.mrf.mxu0  ;;  %v5721_v43 = vadd.f32 %v4180_v41, %v1443_v28 }
 0x264   : > { %v1651_v44 = vpop.f32.mrf.mxu1 }
 0x265   : > { %v5723_v45 = vpop.f32.mrf.mxu0  ;;  %v5725_v46 = vadd.f32 %v1651_v44, %v1438_v60 }
 0x266   : > { %v4183_v47 = vpop.f32.mrf.mxu1 }
 0x267   : > { %v5727_v48 = vpop.f32.mrf.mxu0  ;;  %v5729_v49 = vadd.f32 %v4183_v47, %v1453_v63 }
 0x268   : > { %v1661_v50 = vpop.f32.mrf.mxu1 }
 0x269   : > { %v5731_v51 = vpop.f32.mrf.mxu0  ;;  %v5733_v52 = vadd.f32 %v1661_v50, %v1448_v26 }
 0x26a   : > { %v4186_v53 = vpop.f32.mrf.mxu1 }
 0x26b   : > { %v5735_v54 = vpop.f32.mrf.mxu0  ;;  %v5737_v55 = vadd.f32 %v4186_v53, %v1463_v3 }
 0x26c   : > { %v1671_v27 = vpop.f32.mrf.mxu1 }
 0x26d   : > { %v5739_v56 = vpop.f32.mrf.mxu0  ;;  %v5741_v57 = vadd.f32 %v1671_v27, %v1458_v6 }
 0x26e   : > { %v4189_v28 = vpop.f32.mrf.mxu1 }
 0x26f   : > { %v5743_v58 = vpop.f32.mrf.mxu0  ;;  %v5745_v59 = vadd.f32 %v4189_v28, %v1473_v9 }
 0x270   : > { %v1681_v60 = vpop.f32.mrf.mxu1 }
 0x271   : > { %v5747_v61 = vpop.f32.mrf.mxu0  ;;  %v5749_v62 = vadd.f32 %v1681_v60, %v1468_v12 }
 0x272   : > { %v4192_v63 = vpop.f32.mrf.mxu1 }
 0x273   : > { %v5751_v0 = vpop.f32.mrf.mxu0  ;;  %v5753_v25 = vadd.f32 %v4192_v63, %v1483_v15 }
 0x274   : > { %v1691_v26 = vpop.f32.mrf.mxu1 }
 0x275   : > { %v5755_v1 = vpop.f32.mrf.mxu0  ;;  %v5757_v2 = vadd.f32 %v1691_v26, %v1478_v18 }
 0x276   : > { %v4195_v3 = vpop.f32.mrf.mxu1 }
 0x277   : > { %v5759_v4 = vpop.f32.mrf.mxu0  ;;  %v5761_v5 = vadd.f32 %v4195_v3, %v1493_v21 }
 0x278   : > { %v1701_v6 = vpop.f32.mrf.mxu1 }
 0x279   : > { %v5763_v7 = vpop.f32.mrf.mxu0  ;;  %v5765_v8 = vadd.f32 %v1701_v6, %v1488_v24 }
 0x27a   : > { %v4198_v9 = vpop.f32.mrf.mxu1 }
 0x27b   : > { %v5767_v10 = vpop.f32.mrf.mxu0  ;;  %v5769_v11 = vadd.f32 %v4198_v9, %v1503_v31 }
 0x27c   : > { %v1711_v12 = vpop.f32.mrf.mxu1 }
 0x27d   : > { %v5771_v13 = vpop.f32.mrf.mxu0  ;;  %v5773_v14 = vadd.f32 %v1711_v12, %v1498_v34 }
 0x27e   : > { %v4201_v15 = vpop.f32.mrf.mxu1 }
 0x27f   : > { %v5775_v16 = vpop.f32.mrf.mxu0  ;;  %v5777_v17 = vadd.f32 %v4201_v15, %v1513_v37 }
 0x280   : > { %v1721_v18 = vpop.f32.mrf.mxu1 }
 0x281   : > { %v5779_v19 = vpop.f32.mrf.mxu0  ;;  %v5781_v20 = vadd.f32 %v1721_v18, %v1508_v40 }
 0x282   : > { %6275 = vst [vmem:[#allocation27_spill] sm:$0xff] %v5779_v19  ;;  %v4232_v21 = vpop.f32.mrf.mxu1  ;;  %v1961_v19 = vadd.f32 %v5719_v42, %v5721_v43  ;;  %v1962_v42 = vadd.f32 %v5731_v51, %v5733_v52 }
 0x283   : > { %6276 = vst [vmem:[#allocation28_spill] sm:$0xff] %v5781_v20  ;;  %v4258_v22 = vpop.f32.mrf.mxu0 }
 0x284   : > { %v2111_v23 = vpop.f32.mrf.mxu1 }
 0x285   : > { %v2341_v24 = vpop.f32.mrf.mxu0 }
 0x286   : > { %v4235_v29 = vpop.f32.mrf.mxu1 }
 0x287   : > { %v5783_v30 = vpop.f32.mrf.mxu0 }
 0x288   : > { %v2121_v31 = vpop.f32.mrf.mxu1 }
 0x289   : > { %v5785_v32 = vpop.f32.mrf.mxu0 }
 0x28a   : > { %v4238_v33 = vpop.f32.mrf.mxu1 }
 0x28b   : > { %v5787_v34 = vpop.f32.mrf.mxu0 }
 0x28c   : > { %v5789_v35 = vpop.f32.mrf.mxu1 }
 0x28d   : > { %v5791_v36 = vpop.f32.mrf.mxu0 }
 0x28e   : > { %v5793_v37 = vpop.f32.mrf.mxu1 }
 0x28f   : > { %v5795_v38 = vpop.f32.mrf.mxu0 }
 0x290   : > { %6277 = vst [vmem:[#allocation29_spill] sm:$0xff] %v5795_v38  ;;  %v5797_v39 = vpop.f32.mrf.mxu1 }
 0x291   : > { %v5799_v40 = vpop.f32.mrf.mxu0 }
 0x292   : > { %6278 = vst [vmem:[#allocation30_spill] sm:$0xff] %v5799_v40  ;;  %v5801_v41 = vpop.f32.mrf.mxu1 }
 0x293   : > { %v5803_v44 = vpop.f32.mrf.mxu0 }
 0x294   : > { %6279 = vst [vmem:[#allocation31_spill] sm:$0xff] %v5803_v44  ;;  %v5805_v47 = vpop.f32.mrf.mxu1 }
 0x295   : > { %v5807_v50 = vpop.f32.mrf.mxu0 }
 0x296   : > { %6280 = vst [vmem:[#allocation32_spill] sm:$0xff] %v5807_v50  ;;  %v5809_v53 = vpop.f32.mrf.mxu1 }
 0x297   : > { %6281 = vst [vmem:[#allocation33_spill] sm:$0xff] %v5809_v53  ;;  %v5811_v27 = vpop.f32.mrf.mxu0 }
 0x298   : > { %6282 = vst [vmem:[#allocation34_spill] sm:$0xff] %v5811_v27  ;;  %v5813_v28 = vpop.f32.mrf.mxu1 }
 0x299   : > { %6283 = vst [vmem:[#allocation35_spill] sm:$0xff] %v5813_v28  ;;  %v5815_v60 = vpop.f32.mrf.mxu0 }
 0x29a   : > { %6284 = vst [vmem:[#allocation36_spill] sm:$0xff] %v5815_v60  ;;  %v5817_v63 = vpop.f32.mrf.mxu1 }
 0x29b   : > { %6285 = vst [vmem:[#allocation37_spill] sm:$0xff] %v5817_v63  ;;  %v5819_v26 = vpop.f32.mrf.mxu0 }
 0x29c   : > { %6286 = vst [vmem:[#allocation38_spill] sm:$0xff] %v5819_v26  ;;  %v5821_v3 = vpop.f32.mrf.mxu1 }
 0x29d   : > { %6287 = vst [vmem:[#allocation39_spill] sm:$0xff] %v5821_v3  ;;  %v5823_v6 = vpop.f32.mrf.mxu0 }
 0x29e   : > { %6288 = vst [vmem:[#allocation40_spill] sm:$0xff] %v5823_v6  ;;  %v5825_v9 = vpop.f32.mrf.mxu1 }
 0x29f   : > { %6289 = vst [vmem:[#allocation41_spill] sm:$0xff] %v5825_v9  ;;  %v5827_v12 = vpop.f32.mrf.mxu0 }
 0x2a0   : > { %6290 = vst [vmem:[#allocation42_spill] sm:$0xff] %v5827_v12  ;;  %v5829_v15 = vpop.f32.mrf.mxu1 }
 0x2a1   : > { %6291 = vst [vmem:[#allocation43_spill] sm:$0xff] %v5829_v15  ;;  %v5831_v18 = vpop.f32.mrf.mxu0 }
 0x2a2   : > { %6292 = vst [vmem:[#allocation44_spill] sm:$0xff] %v5831_v18  ;;  %v4284_v27 = vpop.f32.mrf.mxu1 }
 0x2a3   : > { %v4310_v28 = vpop.f32.mrf.mxu0 }
 0x2a4   : > { %v2572_v53 = vpop.f32.mrf.mxu1 }
 0x2a5   : > { %v2802_v60 = vpop.f32.mrf.mxu0 }
 0x2a6   : > { %v4287_v50 = vpop.f32.mrf.mxu1 }
 0x2a7   : > { %v4313_v44 = vpop.f32.mrf.mxu0 }
 0x2a8   : > { %v2582_v63 = vpop.f32.mrf.mxu1 }
 0x2a9   : > { %v5835_v3 = vpop.f32.mrf.mxu0 }
 0x2aa   : > { %v4290_v26 = vpop.f32.mrf.mxu1  ;;  %6294 = vst [vmem:[#allocation46_spill] sm:$0xff] %v5835_v3  ;;  %v1960_v3 = vadd.f32 %v5723_v45, %v5725_v46 }
 0x2ab   : > { %v5841_v12 = vpop.f32.mrf.mxu0 }
 0x2ac   : > { %v5833_v40 = vpop.f32.mrf.mxu1  ;;  %6297 = vst [vmem:[#allocation49_spill] sm:$0xff] %v5841_v12  ;;  %v2190_v12 = vadd.f32 %v2111_v23, %v1960_v3 }
 0x2ad   : > { %6293 = vst [vmem:[#allocation45_spill] sm:$0xff] %v5833_v40  ;;  %v5849_v20 = vpop.f32.mrf.mxu0  ;;  %v2191_v40 = vadd.f32 %v4232_v21, %v1961_v19  ;;  %v2192_v19 = vadd.f32 %v2121_v31, %v1962_v42  ;;  %v6309_v42 = vld [vmem:[#allocation30_spill] sm:$0xff] }
 0x2ae   : > { %v5837_v6 = vpop.f32.mrf.mxu1  ;;  %6300 = vst [vmem:[#allocation52_spill] sm:$0xff] %v5849_v20  ;;  %v2420_v46 = vadd.f32 %v2341_v24, %v2190_v12 }
 0x2af   : > { %6295 = vst [vmem:[#allocation47_spill] sm:$0xff] %v5837_v6  ;;  %v2421_v43 = vadd.f32 %v4258_v22, %v2191_v40  ;;  %v1967_v22 = vadd.f32 %v5743_v58, %v5745_v59  ;;  %v1971_v58 = vadd.f32 %v5759_v4, %v5761_v5  ;;  %v1970_v59 = vadd.f32 %v5763_v7, %v5765_v8 }
 0x2b0   : > { %v5839_v9 = vpop.f32.mrf.mxu1  ;;  %v2651_v52 = vadd.f32 %v2572_v53, %v2420_v46  ;;  %v1973_v4 = vadd.f32 %v5767_v10, %v5769_v11  ;;  %v1975_v10 = vadd.f32 %v5775_v16, %v5777_v17 }
 0x2b1   : > { %6296 = vst [vmem:[#allocation48_spill] sm:$0xff] %v5839_v9  ;;  %v1963_v9 = vadd.f32 %v5727_v48, %v5729_v49  ;;  %v2652_v21 = vadd.f32 %v4284_v27, %v2421_v43  ;;  %v1964_v48 = vadd.f32 %v5739_v56, %v5741_v57  ;;  %v1969_v56 = vadd.f32 %v5751_v0, %v5753_v25  ;;  %v5898_v0 = vld [vmem:[%s6302_s26] ss:$0 sm:$0xff]  ;;  %v6306_v27 = vld [vmem:[#allocation46_spill] sm:$0xff]  ;;  %s6334_s26 = sld [smem:[#allocation66_spill]] }
 0x2b2   : > { %v5843_v15 = vpop.f32.mrf.mxu1  ;;  %v2422_v57 = vadd.f32 %v5785_v32, %v2192_v19  ;;  %v2197_v25 = vadd.f32 %v5793_v37, %v1967_v22  ;;  %v2881_v32 = vadd.f32 %v2802_v60, %v2651_v52  ;;  %v5911_v37 = vld [vmem:[%s6303_s15] ss:$0 sm:$0xff]  ;;  %v6313_v22 = vld [vmem:[#allocation32_spill] sm:$0xff]  ;;  %s3481_s15 = scalar_lea.sflag [#allocation5], %s5120_s0 }
 0x2b3   : > { %6298 = vst [vmem:[#allocation50_spill] sm:$0xff] %v5843_v15  ;;  %v5859_v15 = vpop.f32.mrf.mxu0  ;;  %v2193_v20 = vadd.f32 %v4235_v29, %v1963_v9  ;;  %v2882_v29 = vadd.f32 %v4310_v28, %v2652_v21  ;;  %v2199_v11 = vadd.f32 %v5801_v41, %v1969_v56  ;;  %v6308_v9 = vld [vmem:[#allocation27_spill] sm:$0xff]  ;;  %v6310_v17 = vld [vmem:[#allocation49_spill] sm:$0xff] }
 0x2b4   : > { %v5845_v18 = vpop.f32.mrf.mxu1 }
 0x2b5   : > { %6299 = vst [vmem:[#allocation51_spill] sm:$0xff] %v5845_v18  ;;  %v5871_v23 = vpop.f32.mrf.mxu0  ;;  %v2423_v51 = vadd.f32 %v5783_v30, %v2193_v20  ;;  %v1968_v20 = vadd.f32 %v5755_v1, %v5757_v2  ;;  %v2653_v1 = vadd.f32 %v2582_v63, %v2422_v57  ;;  %v6315_v57 = vld [vmem:[#allocation52_spill] sm:$0xff] }
 0x2b6   : > { %v5851_v38 = vpop.f32.mrf.mxu1  ;;  %v6311_v46 = vld [vmem:[#allocation47_spill] sm:$0xff] }
 0x2b7   : > { %6301 = vst [vmem:[#allocation53_spill] sm:$0xff] %v5851_v38  ;;  %v1965_v38 = vadd.f32 %v5735_v54, %v5737_v55  ;;  %v1966_v54 = vadd.f32 %v5747_v61, %v5749_v62  ;;  %v2194_v55 = vadd.f32 %v5789_v35, %v1964_v48  ;;  %v2654_v31 = vadd.f32 %v4287_v50, %v2423_v51  ;;  %v5893_v62 = vpop.f32.mrf.mxu0  ;;  %v6312_v51 = vld [vmem:[#allocation31_spill] sm:$0xff]  ;;  %s6335_s12 = smov %s6334_s26  ;;  %s6095_s14 = scalar_lea.hbm %s6334_s26, %s3875_s18 }
 0x2b8   : > { %v5855_v6 = vpop.f32.mrf.mxu1  ;;  %v2883_v28 = vadd.f32 %v6306_v27, %v2653_v1  ;;  %v2429_v52 = vadd.f32 %v6312_v51, %v2199_v11  ;;  %v6326_v51 = vld [vmem:[#allocation40_spill] sm:$0xff] }
 0x2b9   : > { %v2195_v49 = vadd.f32 %v4238_v33, %v1965_v38  ;;  %v2424_v5 = vadd.f32 %v5791_v36, %v2194_v55  ;;  %v2196_v7 = vadd.f32 %v5797_v39, %v1966_v54  ;;  %v2884_v35 = vadd.f32 %v4313_v44, %v2654_v31  ;;  %v6304_v39 = vld [vmem:[#allocation45_spill] sm:$0xff]  ;;  %v2842_v53 = vpop.f32.mrf.mxu0 }
 0x2ba   : > { %v5861_v18 = vpop.f32.mrf.mxu1  ;;  %v2198_v36 = vadd.f32 %v5805_v47, %v1968_v20  ;;  %v6314_v55 = vld [vmem:[#allocation33_spill] sm:$0xff] }
 0x2bb   : > { %v2425_v61 = vadd.f32 %v5787_v34, %v2195_v49  ;;  %v1972_v34 = vadd.f32 %v5771_v13, %v5773_v14  ;;  %v2655_v50 = vadd.f32 %v6304_v39, %v2424_v5  ;;  %v6305_v14 = vld [vmem:[#allocation29_spill] sm:$0xff]  ;;  %v2426_v16 = vadd.f32 %v6309_v42, %v2196_v7  ;;  %v4325_v31 = vpop.f32.mrf.mxu0  ;;  %v6318_v7 = vld [vmem:[#allocation50_spill] sm:$0xff] }
 0x2bc   : > { %v5867_v45 = vpop.f32.mrf.mxu1  ;;  %v2427_v44 = vadd.f32 %v6305_v14, %v2197_v25  ;;  %v2428_v54 = vadd.f32 %v6313_v22, %v2198_v36  ;;  %v2201_v56 = vadd.f32 %v6314_v55, %v1971_v58  ;;  %v6319_v39 = vld [vmem:[#allocation34_spill] sm:$0xff]  ;;  %v6322_v27 = vld [vmem:[#allocation51_spill] sm:$0xff]  ;;  %v6327_v22 = vld [vmem:[#allocation41_spill] sm:$0xff] }
 0x2bd   : > { %v2656_v8 = vadd.f32 %v4290_v26, %v2425_v61  ;;  %v6307_v26 = vld [vmem:[#allocation28_spill] sm:$0xff] }
 0x2be   : > { %v5873_v3 = vpop.f32.mrf.mxu1  ;;  %v1974_v12 = vadd.f32 %v6308_v9, %v6307_v26  ;;  %v2658_v19 = vadd.f32 %v6311_v46, %v2427_v44  ;;  %v6316_v61 = vld [vmem:[#allocation48_spill] sm:$0xff] }
 0x2bf   : > { %v2886_v41 = vadd.f32 %v6310_v17, %v2656_v8  ;;  %v2660_v8 = vadd.f32 %v6318_v7, %v2429_v52 }
 0x2c0   : > { %v5881_v24 = vpop.f32.mrf.mxu1  ;;  %v2888_v58 = vadd.f32 %v5859_v15, %v2658_v19 }
 0x2c2   : > { %v4336_v30 = vpop.f32.mrf.mxu1 }
 0x2c3   : > { %v3112_v2 = vadd.f32 %v4336_v30, %v2882_v29  ;;  %v2885_v29 = vadd.f32 %v6315_v57, %v2655_v50  ;;  %v2657_v30 = vadd.f32 %v6316_v61, %v2426_v16  ;;  %v2431_v50 = vadd.f32 %v6319_v39, %v2201_v56  ;;  %v6323_v16 = vld [vmem:[#allocation36_spill] sm:$0xff] }
 0x2c4   : > { %v3032_v33 = vpop.f32.mrf.mxu1 }
 0x2c5   : > { %v3135_v38 = vmul.f32 %v5898_v0, %v3112_v2  ;;  %v3111_v40 = vadd.f32 %v3032_v33, %v2881_v32  ;;  %v6317_v2 = vld [vmem:[#allocation35_spill] sm:$0xff]  ;;  %v2887_v15 = vadd.f32 %v5871_v23, %v2657_v30  ;;  %v6325_v23 = vld [vmem:[#allocation38_spill] sm:$0xff] }
 0x2c6   : > { %v4339_v13 = vpop.f32.mrf.mxu1  ;;  %v2200_v5 = vadd.f32 %v6317_v2, %v1970_v59  ;;  %v6321_v59 = vld [vmem:[#allocation39_spill] sm:$0xff] }
 0x2c7   : > { %v3134_v60 = vmul.f32 %v5898_v0, %v3111_v40  ;;  %v3114_v63 = vadd.f32 %v4339_v13, %v2884_v35  ;;  %v3158_v47 = vadd.f32 %v5911_v37, %v3135_v38  ;;  %v6320_v13 = vld [vmem:[#allocation37_spill] sm:$0xff]  ;;  %v2202_v44 = vadd.f32 %v6321_v59, %v1972_v34  ;;  %v6328_v30 = vld [vmem:[#allocation43_spill] sm:$0xff] }
 0x2c8   : > { %v3042_v43 = vpop.f32.mrf.mxu1  ;;  %v2203_v14 = vadd.f32 %v6320_v13, %v1973_v4  ;;  %v2430_v17 = vadd.f32 %v6323_v16, %v2200_v5 }
 0x2c9   : > { %v3157_v21 = vadd.f32 %v5911_v37, %v3134_v60  ;;  %v3137_v48 = vmul.f32 %v5898_v0, %v3114_v63  ;;  %v3113_v49 = vadd.f32 %v3042_v43, %v2883_v28  ;;  %v3174_v33 = vmax.f32 %v3158_v47, 0.0  ;;  %v2852_v60 = vpop.f32.mrf.mxu0  ;;  %v6324_v43 = vld [vmem:[#allocation53_spill] sm:$0xff] }
 0x2ca   : > { %v4342_v20 = vpop.f32.mrf.mxu1  ;;  %v2659_v28 = vadd.f32 %v6322_v27, %v2428_v54  ;;  %v2662_v46 = vadd.f32 %v6324_v43, %v2431_v50  ;;  %v2432_v52 = vadd.f32 %v6326_v51, %v2202_v44  ;;  %v2205_v54 = vadd.f32 %v6327_v22, %v1975_v10 }
 0x2cb   : > { %v3173_v25 = vmax.f32 %v3157_v21, 0.0  ;;  %v3136_v32 = vmul.f32 %v5898_v0, %v3113_v49  ;;  %v3116_v1 = vadd.f32 %v4342_v20, %v2886_v41  ;;  %v3160_v35 = vadd.f32 %v5911_v37, %v3137_v48  ;;  %v4328_v55 = vpop.f32.mrf.mxu0 }
 0x2cc   : > { %v3052_v38 = vpop.f32.mrf.mxu1  ;;  %v2890_v41 = vadd.f32 %v5893_v62, %v2660_v8  ;;  %v2433_v49 = vadd.f32 %v6325_v23, %v2203_v14  ;;  %v2889_v62 = vadd.f32 %v2842_v53, %v2659_v28  ;;  %v2661_v57 = vadd.f32 %v5855_v6, %v2430_v17  ;;  %v6329_v6 = vld [vmem:[#allocation42_spill] sm:$0xff] }
 0x2cd   : > { %v3159_v40 = vadd.f32 %v5911_v37, %v3136_v32  ;;  %v3139_v11 = vmul.f32 %v5898_v0, %v3116_v1  ;;  %v3115_v36 = vadd.f32 %v3052_v38, %v2885_v29  ;;  %4360 = vmatprep.mubr.msk.f32.mxu0 %vm1034_vm1, %v3173_v25  ;;  %v3176_v47 = vmax.f32 %v3160_v35, 0.0  ;;  %v2862_v38 = vpop.f32.mrf.mxu0 }
 0x2ce   : > { %v4345_v63 = vpop.f32.mrf.mxu1  ;;  %4361 = vmatmul.mubr.msk.f32.vlgmr.msra.gmra.mxu0 %vm1034_vm1, %v3174_v33  ;;  %v2204_v25 = vadd.f32 %v6328_v30, %v1974_v12  ;;  %v2664_v32 = vadd.f32 %v5861_v18, %v2433_v49  ;;  %v2892_v10 = vadd.f32 %v4325_v31, %v2662_v46  ;;  %v2435_v33 = vadd.f32 %v6329_v6, %v2205_v54 }
 0x2cf   : > { %v3175_v26 = vmax.f32 %v3159_v40, 0.0  ;;  %v3138_v9 = vmul.f32 %v5898_v0, %v3115_v36  ;;  %v3118_v42 = vadd.f32 %v4345_v63, %v2888_v58  ;;  %v3162_v4 = vadd.f32 %v5911_v37, %v3139_v11  ;;  %v6330_v11 = vld [vmem:[#allocation44_spill] sm:$0xff] }
 0x2d0   : > { %v3062_v34 = vpop.f32.mrf.mxu1  ;;  %v2663_v35 = vadd.f32 %v5867_v45, %v2432_v52  ;;  %v2891_v18 = vadd.f32 %v2852_v60, %v2661_v57  ;;  %v2434_v36 = vadd.f32 %v6330_v11, %v2204_v25  ;;  %v2894_v39 = vadd.f32 %v4328_v55, %v2664_v32  ;;  %v4331_v60 = vpop.f32.mrf.mxu0 }
 0x2d1   : > { %v3161_v19 = vadd.f32 %v5911_v37, %v3138_v9  ;;  %v3141_v21 = vmul.f32 %v5898_v0, %v3118_v42  ;;  %v3117_v48 = vadd.f32 %v3062_v34, %v2887_v15  ;;  %4363 = vmatprep.mubr.msk.f32.mxu0 %vm1034_vm1, %v3175_v26  ;;  %v3178_v1 = vmax.f32 %v3162_v4, 0.0 }
 0x2d2   : > { %v4348_v56 = vpop.f32.mrf.mxu1  ;;  %4364 = vmatmul.mubr.msk.f32.gmra.mxu0 %vm1034_vm1, %v3176_v47  ;;  %v2666_v59 = vadd.f32 %v5873_v3, %v2435_v33  ;;  %v2893_v28 = vadd.f32 %v2862_v38, %v2663_v35  ;;  %v2665_v15 = vadd.f32 %v5881_v24, %v2434_v36  ;;  %v2872_v43 = vpop.f32.mrf.mxu0  ;;  %v4530_v35 = vld [vmem:[%s5126_s24] sm:$0xff] }
 0x2d3   : > { %v3177_v29 = vmax.f32 %v3161_v19, 0.0  ;;  %v3140_v20 = vmul.f32 %v5898_v0, %v3117_v48  ;;  %v3120_v61 = vadd.f32 %v4348_v56, %v2890_v41  ;;  %v3164_v2 = vadd.f32 %v5911_v37, %v3141_v21 }
 0x2d4   : > { %v3072_v5 = vpop.f32.mrf.mxu1  ;;  %v2896_v41 = vadd.f32 %v4331_v60, %v2666_v59  ;;  %v2895_v24 = vadd.f32 %v2872_v43, %v2665_v15  ;;  %v4533_v60 = vld [vmem:[%s5126_s24 + $0x28] sm:$0xff] }
 0x2d5   : > { %v3163_v53 = vadd.f32 %v5911_v37, %v3140_v20  ;;  %v3143_v7 = vmul.f32 %v5898_v0, %v3120_v61  ;;  %v3119_v8 = vadd.f32 %v3072_v5, %v2889_v62  ;;  %4366 = vmatprep.mubr.msk.f32.mxu0 %vm1034_vm1, %v3177_v29  ;;  %v3180_v50 = vmax.f32 %v3164_v2, 0.0 }
 0x2d6   : > { %v4351_v12 = vpop.f32.mrf.mxu1  ;;  %4367 = vmatmul.mubr.msk.f32.gmra.mxu0 %vm1034_vm1, %v3178_v1 }
 0x2d7   : > { %v3179_v58 = vmax.f32 %v3163_v53, 0.0  ;;  %v3142_v40 = vmul.f32 %v5898_v0, %v3119_v8  ;;  %v3122_v31 = vadd.f32 %v4351_v12, %v2892_v10  ;;  %v3166_v13 = vadd.f32 %v5911_v37, %v3143_v7  ;;  %v4529_v10 = vld [vmem:[%s5126_s24 + $0x8] sm:$0xff] }
 0x2d8   : > { %v3082_v14 = vpop.f32.mrf.mxu1 }
 0x2d9   : > { %v3165_v45 = vadd.f32 %v5911_v37, %v3142_v40  ;;  %v3145_v44 = vmul.f32 %v5898_v0, %v3122_v31  ;;  %v3121_v27 = vadd.f32 %v3082_v14, %v2891_v18  ;;  %4369 = vmatprep.mubr.msk.f32.mxu0 %vm1034_vm1, %v3179_v58  ;;  %v3182_v16 = vmax.f32 %v3166_v13, 0.0  ;;  %v4531_v31 = vld [vmem:[%s5126_s24 + $0x18] sm:$0xff]  ;;  %v4532_v14 = vld [vmem:[%s5126_s24 + $0x10] sm:$0xff] }
 0x2da   : > { %v4354_v63 = vpop.f32.mrf.mxu1  ;;  %4370 = vmatmul.mubr.msk.f32.gmra.mxu0 %vm1034_vm1, %v3180_v50 }
 0x2db   : > { %v3181_v26 = vmax.f32 %v3165_v45, 0.0  ;;  %v3144_v9 = vmul.f32 %v5898_v0, %v3121_v27  ;;  %v3124_v42 = vadd.f32 %v4354_v63, %v2894_v39  ;;  %v3168_v3 = vadd.f32 %v5911_v37, %v3145_v44 }
 0x2dc   : > { %v3092_v17 = vpop.f32.mrf.mxu1 }
 0x2dd   : > { %v3167_v47 = vadd.f32 %v5911_v37, %v3144_v9  ;;  %v3147_v4 = vmul.f32 %v5898_v0, %v3124_v42  ;;  %v3123_v34 = vadd.f32 %v3092_v17, %v2893_v28  ;;  %4372 = vmatprep.mubr.msk.f32.mxu0 %vm1034_vm1, %v3181_v26  ;;  %v3184_v23 = vmax.f32 %v3168_v3, 0.0 }
 0x2de   : > { %v4357_v46 = vpop.f32.mrf.mxu1  ;;  %4373 = vmatmul.mubr.msk.f32.gmra.mxu0 %vm1034_vm1, %v3182_v16  ;;  %v4534_v16 = vld [vmem:[%s5126_s24 + $0x20] sm:$0xff] }
 0x2df   : > { %v3183_v19 = vmax.f32 %v3167_v47, 0.0  ;;  %v3146_v21 = vmul.f32 %v5898_v0, %v3123_v34  ;;  %v3126_v48 = vadd.f32 %v4357_v46, %v2896_v41  ;;  %v3170_v49 = vadd.f32 %v5911_v37, %v3147_v4  ;;  %v4535_v34 = vld [vmem:[%s5126_s24 + $0x38] sm:$0xff] }
 0x2e0   : > { %v3102_v51 = vpop.f32.mrf.mxu1 }
 0x2e1   : > { %v3169_v52 = vadd.f32 %v5911_v37, %v3146_v21  ;;  %v3149_v22 = vmul.f32 %v5898_v0, %v3126_v48  ;;  %v3125_v54 = vadd.f32 %v3102_v51, %v2895_v24  ;;  %4375 = vmatprep.mubr.msk.f32.mxu0 %vm1034_vm1, %v3183_v19  ;;  %v3186_v56 = vmax.f32 %v3170_v49, 0.0  ;;  %v4536_v48 = vld [vmem:[%s5126_s24 + $0x30] sm:$0xff] }
 0x2e2   : > { %4376 = vmatmul.mubr.msk.f32.gmra.mxu0 %vm1034_vm1, %v3184_v23 }
 0x2e3   : > { %v3185_v62 = vmax.f32 %v3169_v52, 0.0  ;;  %v3148_v55 = vmul.f32 %v5898_v0, %v3125_v54  ;;  %v3172_v57 = vadd.f32 %v5911_v37, %v3149_v22  ;;  %v6002_v0 = vld [vmem:[%s6331_s30] ss:$0 sm:$0xff]  ;;  %v4537_v54 = vld [vmem:[%s5126_s24 + $0x48] sm:$0xff] }
 0x2e5   : > { %v3171_v29 = vadd.f32 %v5911_v37, %v3148_v55  ;;  %4378 = vmatprep.mubr.msk.f32.mxu0 %vm1034_vm1, %v3185_v62  ;;  %v3188_v61 = vmax.f32 %v3172_v57, 0.0  ;;  %v6007_v37 = vld [vmem:[%s6332_s21] ss:$0 sm:$0xff] }
 0x2e6   : > { %4379 = vmatmul.mubr.msk.f32.gmra.mxu0 %vm1034_vm1, %v3186_v56 }
 0x2e7   : > { %v3187_v20 = vmax.f32 %v3171_v29, 0.0 }
 0x2e9   : > { %4381 = vmatprep.mubr.msk.f32.mxu0 %vm1034_vm1, %v3187_v20  ;;  %v4538_v20 = vld [vmem:[%s5126_s24 + $0x40] sm:$0xff] }
 0x2ea   : > { %4382 = vmatmul.mubr.msk.f32.gmra.mxu0 %vm1034_vm1, %v3188_v61 }
 0x38e   : > { %v4362_v30 = vpop.f32.mrf.mxu0 }
 0x38f   : > { %v3394_v25 = vmul.f32 %v4362_v30, %v6002_v0 }
 0x390   : > { %v3307_v32 = vpop.f32.mrf.mxu0 }
 0x391   : > { %v3417_v1 = vadd.f32 %v6007_v37, %v3394_v25  ;;  %v3393_v2 = vmul.f32 %v6002_v0, %v3307_v32 }
 0x392   : > { %v4365_v5 = vpop.f32.mrf.mxu0 }
 0x393   : > { %v3433_v53 = vadd.f32 %v4529_v10, %v3417_v1  ;;  %v3416_v7 = vadd.f32 %v6007_v37, %v3393_v2  ;;  %v3396_v8 = vmul.f32 %v4365_v5, %v6002_v0  ;;  %v4539_v2 = vld [vmem:[%s5126_s24 + $0x58] sm:$0xff] }
 0x394   : > { %v3317_v6 = vpop.f32.mrf.mxu0 }
 0x395   : > { %v3449_v33 = vmax.f32 %v3433_v53, 0.0  ;;  %v3432_v38 = vadd.f32 %v4530_v35, %v3416_v7  ;;  %v3419_v12 = vadd.f32 %v6007_v37, %v3396_v8  ;;  %v3395_v18 = vmul.f32 %v6002_v0, %v3317_v6  ;;  %v4540_v6 = vld [vmem:[%s5126_s24 + $0x50] sm:$0xff] }
 0x396   : > { %v4368_v58 = vpop.f32.mrf.mxu0 }
 0x397   : > { %3465 = vst.msk [vmem:[%s6020_s6 + $0x8] sm:$0xff] %vm590_vm0, %v3449_v33  ;;  %v3448_v40 = vmax.f32 %v3432_v38, 0.0  ;;  %v3435_v11 = vadd.f32 %v4531_v31, %v3419_v12  ;;  %v3418_v36 = vadd.f32 %v6007_v37, %v3395_v18  ;;  %v3398_v39 = vmul.f32 %v4368_v58, %v6002_v0  ;;  %v4541_v58 = vld [vmem:[%s5126_s24 + $0x68] sm:$0xff] }
 0x398   : > { %v3327_v50 = vpop.f32.mrf.mxu0 }
 0x399   : > { %3464 = vst.msk [vmem:[%s6020_s6] sm:$0xff] %vm590_vm0, %v3448_v40  ;;  %v3451_v13 = vmax.f32 %v3435_v11, 0.0  ;;  %v3434_v59 = vadd.f32 %v4532_v14, %v3418_v36  ;;  %v3421_v45 = vadd.f32 %v6007_v37, %v3398_v39  ;;  %v3397_v44 = vmul.f32 %v6002_v0, %v3327_v50  ;;  %v4542_v50 = vld [vmem:[%s5126_s24 + $0x60] sm:$0xff] }
 0x39a   : > { %v4371_v27 = vpop.f32.mrf.mxu0 }
 0x39b   : > { %3467 = vst.msk [vmem:[%s6020_s6 + $0x18] sm:$0xff] %vm590_vm0, %v3451_v13  ;;  %v3450_v28 = vmax.f32 %v3434_v59, 0.0  ;;  %v3437_v63 = vadd.f32 %v4533_v60, %v3421_v45  ;;  %v3420_v15 = vadd.f32 %v6007_v37, %v3397_v44  ;;  %v3400_v26 = vmul.f32 %v4371_v27, %v6002_v0  ;;  %v4543_v44 = vld [vmem:[%s5126_s24 + $0x78] sm:$0xff] }
 0x39c   : > { %v3337_v9 = vpop.f32.mrf.mxu0 }
 0x39d   : > { %3466 = vst.msk [vmem:[%s6020_s6 + $0x10] sm:$0xff] %vm590_vm0, %v3450_v28  ;;  %v3453_v42 = vmax.f32 %v3437_v63, 0.0  ;;  %v3436_v3 = vadd.f32 %v4534_v16, %v3420_v15  ;;  %v3423_v17 = vadd.f32 %v6007_v37, %v3400_v26  ;;  %v3399_v41 = vmul.f32 %v6002_v0, %v3337_v9  ;;  %v4544_v63 = vld [vmem:[%s5126_s24 + $0x70] sm:$0xff]  ;;  %s4789_s24 = smov [#allocation9]  }
 0x39e   : > { %v4374_v47 = vpop.f32.mrf.mxu0  ;;  %s4633_s13 = sshll.u32 %s4789_s24, 4  ;;  %s4634_s13 = int_to_ptr.vmem [resolvable:$false] %s4633_s13 }
 0x39f   : > { %3469 = vst.msk [vmem:[%s6020_s6 + $0x28] sm:$0xff] %vm590_vm0, %v3453_v42  ;;  %v3452_v4 = vmax.f32 %v3436_v3, 0.0  ;;  %v3439_v43 = vadd.f32 %v4535_v34, %v3423_v17  ;;  %v3422_v46 = vadd.f32 %v6007_v37, %v3399_v41  ;;  %v3402_v24 = vmul.f32 %v4374_v47, %v6002_v0  ;;  %s4635_s30 = scalar_lea.vmem %s4634_s13, 4096  ;;  %p4636_p1 = scmp.lt.s32.totalorder %s6097_s4, %s4634_s13 }
 0x3a0   : > { %v3347_v19 = vpop.f32.mrf.mxu0  ;;  %p4637_p8 = scmp.lt.s32.totalorder %s4635_s30, %s4629_s29 }
 0x3a1   : > { %3468 = vst.msk [vmem:[%s6020_s6 + $0x20] sm:$0xff] %vm590_vm0, %v3452_v4  ;;  %v3455_v21 = vmax.f32 %v3439_v43, 0.0  ;;  %v3438_v23 = vadd.f32 %v4536_v48, %v3422_v46  ;;  %v3425_v49 = vadd.f32 %v6007_v37, %v3402_v24  ;;  %v3401_v51 = vmul.f32 %v6002_v0, %v3347_v19 }
 0x3a2   : > { %v4377_v52 = vpop.f32.mrf.mxu0  ;;  %p4638_p5 = por %p4637_p8, %p4636_p1 }
 0x3a3   : > { %3471 = vst.msk [vmem:[%s6020_s6 + $0x38] sm:$0xff] %vm590_vm0, %v3455_v21  ;;  %v3454_v22 = vmax.f32 %v3438_v23, 0.0  ;;  %v3441_v62 = vadd.f32 %v4537_v54, %v3425_v49  ;;  %v3424_v55 = vadd.f32 %v6007_v37, %v3401_v51  ;;  %v3404_v56 = vmul.f32 %v4377_v52, %v6002_v0 }
 0x3a4   : > { %v3357_v57 = vpop.f32.mrf.mxu0  ;;  %p4639_p6 = pnand %p4638_p5, %p4632_p3 }
 0x3a5   : > { %3470 = vst.msk [vmem:[%s6020_s6 + $0x30] sm:$0xff] %vm590_vm0, %v3454_v22  ;;  %v3457_v29 = vmax.f32 %v3441_v62, 0.0  ;;  %v3440_v61 = vadd.f32 %v4538_v20, %v3424_v55  ;;  %v3427_v30 = vadd.f32 %v6007_v37, %v3404_v56  ;;  %v3403_v25 = vmul.f32 %v6002_v0, %v3357_v57 }
 0x3a6   : > { %v4380_v32 = vpop.f32.mrf.mxu0 }
 0x3a7   : > { %3473 = vst.msk [vmem:[%s6020_s6 + $0x48] sm:$0xff] %vm590_vm0, %v3457_v29  ;;  %v3456_v1 = vmax.f32 %v3440_v61, 0.0  ;;  %v3443_v5 = vadd.f32 %v4539_v2, %v3427_v30  ;;  %v3426_v10 = vadd.f32 %v6007_v37, %v3403_v25  ;;  %v3406_v53 = vmul.f32 %v4380_v32, %v6002_v0 }
 0x3a8   : > { %v3367_v7 = vpop.f32.mrf.mxu0 }
 0x3a9   : > { %3472 = vst.msk [vmem:[%s6020_s6 + $0x40] sm:$0xff] %vm590_vm0, %v3456_v1  ;;  %v3459_v8 = vmax.f32 %v3443_v5, 0.0  ;;  %v3442_v33 = vadd.f32 %v4540_v6, %v3426_v10  ;;  %v3429_v35 = vadd.f32 %v6007_v37, %v3406_v53  ;;  %v3405_v38 = vmul.f32 %v6002_v0, %v3367_v7 }
 0x3aa   : > { %v4383_v12 = vpop.f32.mrf.mxu0 }
 0x3ab   : > { %3475 = vst.msk [vmem:[%s6020_s6 + $0x58] sm:$0xff] %vm590_vm0, %v3459_v8  ;;  %v3458_v18 = vmax.f32 %v3442_v33, 0.0  ;;  %v3445_v40 = vadd.f32 %v4541_v58, %v3429_v35  ;;  %v3428_v31 = vadd.f32 %v6007_v37, %v3405_v38  ;;  %v3408_v11 = vmul.f32 %v4383_v12, %v6002_v0 }
 0x3ac   : > { %v3377_v36 = vpop.f32.mrf.mxu0 }
 0x3ad   : > { %3474 = vst.msk [vmem:[%s6020_s6 + $0x50] sm:$0xff] %vm590_vm0, %v3458_v18  ;;  %v3461_v39 = vmax.f32 %v3445_v40, 0.0  ;;  %v3444_v13 = vadd.f32 %v4542_v50, %v3428_v31  ;;  %v3431_v14 = vadd.f32 %v6007_v37, %v3408_v11  ;;  %v3407_v59 = vmul.f32 %v6002_v0, %v3377_v36 }
 0x3af   : > { %3477 = vst.msk [vmem:[%s6020_s6 + $0x68] sm:$0xff] %vm590_vm0, %v3461_v39  ;;  %v3460_v45 = vmax.f32 %v3444_v13, 0.0  ;;  %v3447_v27 = vadd.f32 %v4543_v44, %v3431_v14  ;;  %v3430_v28 = vadd.f32 %v6007_v37, %v3407_v59 }
 0x3b1   : > { %3476 = vst.msk [vmem:[%s6020_s6 + $0x60] sm:$0xff] %vm590_vm0, %v3460_v45  ;;  %v3463_v60 = vmax.f32 %v3447_v27, 0.0  ;;  %v3446_v15 = vadd.f32 %v4544_v63, %v3430_v28 }
 0x3b3   : > { %3479 = vst.msk [vmem:[%s6020_s6 + $0x78] sm:$0xff] %vm590_vm0, %v3463_v60  ;;  %v3462_v0 = vmax.f32 %v3446_v15, 0.0 }
 0x3b5   : > { %3478 = vst.msk [vmem:[%s6020_s6 + $0x70] sm:$0xff] %vm590_vm0, %v3462_v0 }
 0x3b6   : > { %4642 = shalt.err (!%p4639_p6)
}
 0x3b7   : > { %s4643_s25 = scalar_lea.hbm %s6095_s14, 2048  ;;  %s4647_s6 = scalar_lea.hbm %s6335_s12, 8192 }
 0x3b8   : > { %p4644_p10 = scmp.ne.s32.totalorder %s6095_s14, %s4643_s25  ;;  %p4648_p2 = scmp.lt.s32.totalorder %s6095_s14, %s6335_s12 }
 0x3b9   : > { %p4649_p11 = scmp.lt.s32.totalorder %s4647_s6, %s4643_s25 }
 0x3ba   : > { %p4645_p13 = pnand %p4644_p10, %p6336_p7 }
 0x3bb   : > { %p4650_p4 = por %p4649_p11, %p4648_p2 }
 0x3bc   : > { %p4646_p0 = pneg %p4645_p13 }
 0x3be   : > { %p4651_p12 = pnand %p4650_p4, %p4646_p0 }
 0x3c0   : > { %4654 = shalt.err (!%p4651_p12)
}
 0x3c1   : > { %s4790_s1 = smov 128   ;;  %s4791_s17 = smov 8  }
 0x3c2   : > { %4394 = dma.vmem_to_hbm [thread:$0]  (%p6336_p7), %s6097_s4, 2048, %s6095_s14, %s3481_s15, %s4790_s1, %s4790_s1, %s4791_s17  }
 0x3c3 PF: > { %p4411_p9 = scmp.ge.s32.totalorder %s4781_s16, 2  ;;  %s3512_s18 = sand.u32 1, %s4753_s27  }
 0x3c4   : > { %p6337_p3 = scmp.ne.s32.totalorder %s6249_s5, 0  ;;  %s3513_s2 = scalar_lea.sflag [#allocation5], %s3512_s18 }
 0x3c6   : > { %p4407_p1 = pnand %p4411_p9, %p6337_p3 }
 0x3c8   : > { %p4408_p8 = pneg %p4407_p1 }
 0x3ca   : > { %4724 = dma.done.wait (%p4408_p8), %s3513_s2, 2048  }
 0x3cb   : > { %4726 = vsyncadd (%p4408_p8), %s3513_s2, 4294965248  ;;  %s31_s16 = sadd.s32 1, %s4781_s16   ;;  %s6339_s24 = sld [smem:[#allocation14_spill]] }
 0x3cc   : > { %p6131_p5 = scmp.ge.s32.totalorder %s31_s16, 6   ;;  %s6340_s25 = sld [smem:[#allocation15_spill]] }
 0x3cd   : > { %s6341_s26 = sld [smem:[#allocation25_spill]]  ;;  %s6348_s21 = smov %s4733_s22 }
 0x3ce   : > { %s6342_s8 = sld [smem:[#allocation16_spill]]  ;;  %s6349_s22 = smov %s4737_s23 }
 0x3cf   : > { %s6343_s29 = sld [smem:[#allocation26_spill]]  ;;  %s6350_s23 = smov %s5095_s7 }
 0x3d0   : > { %s6344_s30 = sld [smem:[#allocation19_spill]]  ;;  %s6351_s27 = smov %s4757_s28 }
 0x3d1   : > { %s6345_s13 = sld [smem:[#allocation20_spill]]  ;;  %30 = sbr.rel (!%p6131_p5) target bundleno = 26 (0x1a), region = 148 }
 0x3d2   : > { %s6346_s14 = sld [smem:[#allocation21_spill]] }
 0x3d3   : > { %s6347_s15 = sld [smem:[#allocation22_spill]] }
 0x3d4   : > { %s6352_s28 = smov %s6342_s8 }
 0x3d6   :  { %3518 = vsyncpa [#allocation4], 1 }
 0x3d7   :  { %3520 = vsyncpa [#allocation4 + $0x1], 1 }
 0x3d8   :  { %3521 = vsyncpa [#allocation7], 1 }
 0x3d9   :  { %3523 = vsyncpa [#allocation7 + $0x1], 1 }
 0x3da   :  { %3524 = vsyncpa [#allocation5], 1 }
 0x3db   :  { %3526 = vsyncpa [#allocation5 + $0x1], 1 }

</bundles_post_ra>
